<compile_context>
chip_gen: v7x
topology: tpu7x:2x2x1
jax: 0.10.0
libtpu: 0.0.40
codegen_flags: <defaults>
</compile_context>

<pallas_src>
import functools
import math

import jax
import jax.numpy as jnp
from jax.experimental import pallas as pl
from jax.experimental.pallas import tpu as pltpu


# MXU input dtype for the big GEMMs (accumulation is always f32).
MXU_DTYPE = jnp.bfloat16


def _round_up(x, m):
    return (x + m - 1) // m * m


def _pick_tile(dim, cap):
    """Largest divisor of `dim` that is a multiple of 128 and <= cap."""
    best = 128
    for c in range(128, min(dim, cap) + 1, 128):
        if dim % c == 0:
            best = c
    return best


def _pick_row_tile(mp, cap=512):
    """Largest divisor of `mp` that is a multiple of 8 and <= cap."""
    assert mp % 8 == 0
    best = 8
    for t in range(8, min(mp, cap) + 1, 8):
        if mp % t == 0:
            best = t
    return best


@functools.lru_cache(maxsize=1)
def _vmem_limit_bytes():
    cap = 64 << 20                      # conservative fallback (v7x physical)
    try:
        cap = int(getattr(pltpu.get_tpu_info(), "vmem_capacity_bytes", cap))
    except Exception:
        pass
    return max(32 << 20, min(96 << 20, (cap * 3) // 4))


# -----------------------------------------------------------------------------
# Fused GEMM kernel:  out = [LayerNorm]( [relu](A @ W + bias) [+ residual] )
# -----------------------------------------------------------------------------
def _gemm_kernel(*refs, fuse_relu, fuse_residual, fuse_ln, n_valid, eps,
                 single_k):
    a_ref, w_ref, b_ref = refs[0], refs[1], refs[2]
    pos = 3
    res_ref = None
    if fuse_residual:
        res_ref = refs[pos]
        pos += 1
    g_ref = bln_ref = None
    if fuse_ln:
        g_ref, bln_ref = refs[pos], refs[pos + 1]
        pos += 2
    o_ref = refs[pos]
    pos += 1
    acc_ref = None if single_k else refs[pos]

    a = a_ref[...]
    if a.dtype != MXU_DTYPE:
        a = a.astype(MXU_DTYPE)
    w = w_ref[...]
    if w.dtype != MXU_DTYPE:
        w = w.astype(MXU_DTYPE)
    part = jnp.dot(a, w, preferred_element_type=jnp.float32)

    def epilogue(y):
        y = y + b_ref[...]
        if fuse_relu:
            y = jnp.maximum(y, 0.0)
        if fuse_residual:
            y = y + res_ref[...].astype(jnp.float32)
        if fuse_ln:
            # LayerNorm over the first `n_valid` lanes only (padded lanes are
            # excluded from mean/var and produce exactly 0 in the output).
            lane = jax.lax.broadcasted_iota(jnp.int32, y.shape, 1)
            mask = lane < n_valid
            ym = jnp.where(mask, y, 0.0)
            mu = jnp.sum(ym, axis=-1, keepdims=True) * (1.0 / n_valid)
            d = jnp.where(mask, y - mu, 0.0)
            var = jnp.sum(d * d, axis=-1, keepdims=True) * (1.0 / n_valid)
            y = d * jax.lax.rsqrt(var + eps) * g_ref[...] + bln_ref[...]
        return y

    if single_k:
        o_ref[...] = epilogue(part).astype(o_ref.dtype)
    else:
        @pl.when(pl.program_id(2) == 0)
        def _():
            acc_ref[...] = jnp.zeros_like(acc_ref)

        acc_ref[...] += part

        @pl.when(pl.program_id(2) == pl.num_programs(2) - 1)
        def _():
            o_ref[...] = epilogue(acc_ref[...]).astype(o_ref.dtype)


def gemm_fused(a, w, b, *, residual=None, ln_gamma=None, ln_beta=None,
               relu=False, ln_valid=None, eps=1e-5, out_dtype=jnp.float32):
    """A:(Mp,Kp) @ W:(Kp,Np) with bias / ReLU / residual / LayerNorm fused into
    the GEMM epilogue.  Kp, Np must be multiples of 128 (weights pre-padded and
    cast to bf16 once at build time); Mp must be a multiple of 8."""
    Mp, Kp = a.shape
    Kp2, Np = w.shape
    assert Kp == Kp2 and Kp % 128 == 0 and Np % 128 == 0 and Mp % 8 == 0
    fuse_ln = ln_gamma is not None
    tm = _pick_row_tile(Mp, 512)
    tk = _pick_tile(Kp, 2048)                 # full K when it fits
    tn = Np if fuse_ln else _pick_tile(Np, 512)
    if fuse_ln:
        assert Np <= 512, "LayerNorm-fused epilogue needs a single N tile"
    assert Mp % tm == 0 and Np % tn == 0 and Kp % tk == 0
    grid = (Mp // tm, Np // tn, Kp // tk)
    single_k = (grid[2] == 1)

    in_specs = [pl.BlockSpec((tm, tk), lambda i, j, k: (i, k)),
                pl.BlockSpec((tk, tn), lambda i, j, k: (k, j)),
                pl.BlockSpec((1, tn), lambda i, j, k: (0, j))]
    args = [a, w, b.reshape(1, Np)]
    if residual is not None:
        in_specs.append(pl.BlockSpec((tm, tn), lambda i, j, k: (i, j)))
        args.append(residual)
    if fuse_ln:
        in_specs += [pl.BlockSpec((1, tn), lambda i, j, k: (0, j)),
                     pl.BlockSpec((1, tn), lambda i, j, k: (0, j))]
        args += [ln_gamma.reshape(1, Np), ln_beta.reshape(1, Np)]

    kernel = functools.partial(
        _gemm_kernel, fuse_relu=relu, fuse_residual=residual is not None,
        fuse_ln=fuse_ln, n_valid=(ln_valid if fuse_ln else 0), eps=eps,
        single_k=single_k)

    scratch = [] if single_k else [pltpu.VMEM((tm, tn), jnp.float32)]

    return pl.pallas_call(
        kernel,
        out_shape=jax.ShapeDtypeStruct((Mp, Np), out_dtype),
        grid_spec=pltpu.PrefetchScalarGridSpec(
            num_scalar_prefetch=0,
            grid=grid,
            in_specs=in_specs,
            out_specs=pl.BlockSpec((tm, tn), lambda i, j, k: (i, j)),
            scratch_shapes=scratch),
        compiler_params=pltpu.CompilerParams(
            dimension_semantics=("parallel", "parallel", "arbitrary"),
            vmem_limit_bytes=_vmem_limit_bytes()),
    )(*args)


# -----------------------------------------------------------------------------
# Attention core: per batch element, all heads, straight from the QKV GEMM
# layout (no XLA split_heads / k-transpose / merge copies).
# -----------------------------------------------------------------------------
def _attention_kernel(q_ref, k_ref, v_ref, o_ref, *, H, Dh, S, Sp, E, Ep):
    q = q_ref[...]                      # (Sp, Ep) bf16 (1/sqrt(Dh) folded in)
    k = k_ref[...]                      # (Sp, Ep) bf16
    v = v_ref[...]                      # (Sp, Ep) bf16
    need_mask = Sp > S
    if need_mask:
        kmask = jax.lax.broadcasted_iota(jnp.int32, (Sp, Sp), 1) < S

    outs = []
    for h in range(H):                  # static unroll over heads
        lo = h * Dh
        qh = q[:, lo:lo + Dh]
        kh = k[:, lo:lo + Dh]
        vh = v[:, lo:lo + Dh]
        # q @ k^T without any HBM transpose: contract last dims on the MXU.
        s = jax.lax.dot_general(qh, kh, (((1,), (1,)), ((), ())),
                                preferred_element_type=jnp.float32)  # (Sp,Sp)
        if need_mask:
            s = jnp.where(kmask, s, -jnp.inf)
        m = jnp.max(s, axis=-1, keepdims=True)
        p = jnp.exp(s - m)
        l = jnp.sum(p, axis=-1, keepdims=True)
        oh = jnp.dot(p.astype(MXU_DTYPE), vh,
                     preferred_element_type=jnp.float32)             # (Sp,Dh)
        outs.append(oh * pl.reciprocal(l, approx=True))
    if Ep > E:
        outs.append(jnp.zeros((Sp, Ep - E), jnp.float32))
    # Single lane-dense store, already in the row layout of the next GEMM.
    o_ref[...] = jnp.concatenate(outs, axis=-1).astype(o_ref.dtype)


def attention(qkv, *, H, Dh, S, E):
    """qkv: (B, Sp, 3*Ep) bf16 from the fused in-projection GEMM (batch-major
    rows).  Returns (B, Sp, Ep) bf16 with heads concatenated along E."""
    B, Sp, three_ep = qkv.shape
    Ep = three_ep // 3
    kernel = functools.partial(_attention_kernel, H=H, Dh=Dh, S=S, Sp=Sp,
                               E=E, Ep=Ep)
    return pl.pallas_call(
        kernel,
        out_shape=jax.ShapeDtypeStruct((B, Sp, Ep), MXU_DTYPE),
        grid_spec=pltpu.PrefetchScalarGridSpec(
            num_scalar_prefetch=0,
            grid=(B,),
            in_specs=[pl.BlockSpec((None, Sp, Ep), lambda b: (b, 0, 0)),
                      pl.BlockSpec((None, Sp, Ep), lambda b: (b, 0, 1)),
                      pl.BlockSpec((None, Sp, Ep), lambda b: (b, 0, 2))],
            out_specs=pl.BlockSpec((None, Sp, Ep), lambda b: (b, 0, 0))),
        compiler_params=pltpu.CompilerParams(
            dimension_semantics=("parallel",),
            vmem_limit_bytes=_vmem_limit_bytes()),
    )(qkv, qkv, qkv)


# -----------------------------------------------------------------------------
# Layer forward (single jax.jit around everything)
# -----------------------------------------------------------------------------
def transformer_encoder_layer(params, src, *, nhead):
    """torch.nn.TransformerEncoderLayer forward, eval mode (dropout=identity).

    src: (S, B, E) like torch MultiheadAttention (seq, batch, embed)."""
    S, B, E = src.shape
    H = nhead
    Dh = E // H
    Ep = params['w_out'].shape[0]          # padded d_model (multiple of 128)
    Sp = _round_up(S, 16)                  # bf16-friendly sublane padding
    Mp = B * Sp

    # Batch-major padded layout for the whole layer: (B, Sp, Ep) -> (Mp, Ep).
    x = src.astype(jnp.float32).transpose(1, 0, 2)                 # (B,S,E)
    x = jnp.pad(x, ((0, 0), (0, Sp - S), (0, Ep - E))).reshape(Mp, Ep)

    # --- self-attention: fused QKV in-projection (q-scale folded into w_in) ---
    qkv = gemm_fused(x, params['w_in'], params['b_in'],
                     out_dtype=MXU_DTYPE)                          # (Mp,3Ep) bf16
    qkv = qkv.reshape(B, Sp, 3 * Ep)                               # free reshape

    o = attention(qkv, H=H, Dh=Dh, S=S, E=E)                       # (B,Sp,Ep) bf16
    o = o.reshape(Mp, Ep)                                          # free reshape

    # --- out-projection + residual + LayerNorm1, all in the GEMM epilogue ---
    x1 = gemm_fused(o, params['w_out'], params['b_out'], residual=x,
                    ln_gamma=params['ln1_g'], ln_beta=params['ln1_b'],
                    ln_valid=E)

    # --- feed-forward: linear1+ReLU fused; linear2+residual+LayerNorm2 fused ---
    h = gemm_fused(x1, params['w1'], params['b1'], relu=True,
                   out_dtype=MXU_DTYPE)
    x2 = gemm_fused(h, params['w2'], params['b2'], residual=x1,
                    ln_gamma=params['ln2_g'], ln_beta=params['ln2_b'],
                    ln_valid=E)

    # Back to (S, B, E): tiny slice + transpose at the layer boundary only.
    return x2.reshape(B, Sp, Ep)[:, :S, :E].transpose(1, 0, 2)


# -----------------------------------------------------------------------------
# Parameters (deterministic) + pure-JAX reference for validation
# -----------------------------------------------------------------------------
def make_raw_params(key, d_model, nhead, dim_feedforward):
    E, FF = d_model, dim_feedforward
    assert E % nhead == 0
    ks = jax.random.split(key, 12)

    def nrm(k, shape, fan_in):
        return jax.random.normal(k, shape, jnp.float32) / math.sqrt(fan_in)

    return dict(
        wq=nrm(ks[0], (E, E), E), wk=nrm(ks[1], (E, E), E), wv=nrm(ks[2], (E, E), E),
        b_in=0.02 * jax.random.normal(ks[3], (3 * E,), jnp.float32),
        w_out=nrm(ks[4], (E, E), E),
        b_out=0.02 * jax.random.normal(ks[5], (E,), jnp.float32),
        w1=nrm(ks[6], (E, FF), E),
        b1=0.02 * jax.random.normal(ks[7], (FF,), jnp.float32),
        w2=nrm(ks[8], (FF, E), FF),
        b2=0.02 * jax.random.normal(ks[9], (E,), jnp.float32),
        ln1_g=1.0 + 0.1 * jax.random.normal(ks[10], (E,), jnp.float32),
        ln1_b=0.1 * jax.random.normal(ks[10], (E,), jnp.float32),
        ln2_g=1.0 + 0.1 * jax.random.normal(ks[11], (E,), jnp.float32),
        ln2_b=0.1 * jax.random.normal(ks[11], (E,), jnp.float32),
    )


def pad_params(raw, d_model, nhead, dim_feedforward):
    """Pad weights once to lane-aligned widths, store them in bf16, and fold
    1/sqrt(Dh) into the q projection.  Biases / LN params stay f32 (epilogue)."""
    E, FF = d_model, dim_feedforward
    Dh = E // nhead
    Ep, FFp = _round_up(E, 128), _round_up(FF, 128)
    scale = 1.0 / math.sqrt(Dh)

    def pad2(w, kp, np_):
        return jnp.pad(w, ((0, kp - w.shape[0]), (0, np_ - w.shape[1])))

    def pad1(v, np_):
        return jnp.pad(v, (0, np_ - v.shape[0]))

    w_in = jnp.zeros((Ep, 3 * Ep), jnp.float32)
    w_in = w_in.at[:E, 0:E].set(raw['wq'] * scale)
    w_in = w_in.at[:E, Ep:Ep + E].set(raw['wk'])
    w_in = w_in.at[:E, 2 * Ep:2 * Ep + E].set(raw['wv'])
    b_in = jnp.zeros((3 * Ep,), jnp.float32)
    b_in = b_in.at[0:E].set(raw['b_in'][0:E] * scale)
    b_in = b_in.at[Ep:Ep + E].set(raw['b_in'][E:2 * E])
    b_in = b_in.at[2 * Ep:2 * Ep + E].set(raw['b_in'][2 * E:3 * E])

    return dict(
        w_in=w_in.astype(MXU_DTYPE), b_in=b_in,
        w_out=pad2(raw['w_out'], Ep, Ep).astype(MXU_DTYPE),
        b_out=pad1(raw['b_out'], Ep),
        w1=pad2(raw['w1'], Ep, FFp).astype(MXU_DTYPE),
        b1=pad1(raw['b1'], FFp),
        w2=pad2(raw['w2'], FFp, Ep).astype(MXU_DTYPE),
        b2=pad1(raw['b2'], Ep),
        ln1_g=pad1(raw['ln1_g'], Ep), ln1_b=pad1(raw['ln1_b'], Ep),
        ln2_g=pad1(raw['ln2_g'], Ep), ln2_b=pad1(raw['ln2_b'], Ep),
    )


def reference_forward(raw, src, *, nhead, eps=1e-5):
    """Plain-jnp reference of the PyTorch layer (eval mode)."""
    S, B, E = src.shape
    H, Dh = nhead, E // nhead
    rows = src.astype(jnp.float32).reshape(S * B, E)
    q = (rows @ raw['wq'] + raw['b_in'][:E]) * (1.0 / math.sqrt(Dh))
    k = rows @ raw['wk'] + raw['b_in'][E:2 * E]
    v = rows @ raw['wv'] + raw['b_in'][2 * E:]

    def heads(t):
        return t.reshape(S, B, H, Dh).transpose(1, 2, 0, 3)     # (B,H,S,Dh)

    attn = jax.nn.softmax(jnp.einsum('bhsd,bhtd->bhst', heads(q), heads(k)), -1)
    o = jnp.einsum('bhst,bhtd->bhsd', attn, heads(v))
    o = o.transpose(2, 0, 1, 3).reshape(S * B, E)
    src2 = o @ raw['w_out'] + raw['b_out']

    def ln(t, g, b):
        mu = jnp.mean(t, axis=-1, keepdims=True)
        d = t - mu
        var = jnp.mean(d * d, axis=-1, keepdims=True)
        return d * jax.lax.rsqrt(var + eps) * g + b

    y = ln(rows + src2, raw['ln1_g'], raw['ln1_b'])
    hid = jnp.maximum(y @ raw['w1'] + raw['b1'], 0.0)
    y2 = ln(y + hid @ raw['w2'] + raw['b2'], raw['ln2_g'], raw['ln2_b'])
    return y2.reshape(S, B, E)


# -----------------------------------------------------------------------------
if __name__ == "__main__":
    S, B, E, H, FF = 8, 2, 32, 4, 64        # (seq, batch, d_model, nhead, ffn)
    key = jax.random.PRNGKey(0)
    kp, kx = jax.random.split(key)

    raw = make_raw_params(kp, E, H, FF)
    params = pad_params(raw, E, H, FF)
    src = jax.random.normal(kx, (S, B, E), jnp.float32)

    fwd = jax.jit(functools.partial(transformer_encoder_layer, nhead=H))
    out = jax.block_until_ready(fwd(params, src))

    assert out.shape == (S, B, E), out.shape
    assert bool(jnp.all(jnp.isfinite(out)))

    # Validate against the pure-JAX f32 reference (kernel uses bf16 MXU inputs
    # and bf16 storage of the large intermediates, f32 accumulation).
    ref = reference_forward(raw, src, nhead=H)
    err = float(jnp.max(jnp.abs(out - ref)))
    assert err < 1e-1, f"mismatch vs reference: max abs err {err}"

    print("KERNEL_OK")
</pallas_src>

<mosaic_0001>
module attributes {stable_mosaic.version = 11 : i64} {
  func.func @_gemm_kernel(%arg0: i32, %arg1: i32, %arg2: i32, %arg3: memref<32x128xf32, #tpu.memory_space<vmem>>, %arg4: memref<128x384xbf16, #tpu.memory_space<vmem>>, %arg5: memref<1x384xf32, #tpu.memory_space<vmem>>, %arg6: memref<32x384xbf16, #tpu.memory_space<vmem>>) attributes {dimension_semantics = [#tpu.dimension_semantics<parallel>, #tpu.dimension_semantics<parallel>, #tpu.dimension_semantics<arbitrary>], iteration_bounds = array<i64: 1, 1, 1>, scalar_prefetch = 0 : i64, scratch_operands = 0 : i64, tpu.core_type = #tpu.core_type<tc>, window_params = [{transform_indices = @transform_0, window_bounds = array<i64: 32, 128>}, {transform_indices = @transform_1, window_bounds = array<i64: 128, 384>}, {transform_indices = @transform_2, window_bounds = array<i64: 1, 384>}, {transform_indices = @transform_3, window_bounds = array<i64: 32, 384>}]} {
    %c0 = arith.constant 0 : index
    %c0_0 = arith.constant 0 : index
    %0 = vector.load %arg3[%c0, %c0_0] : memref<32x128xf32, #tpu.memory_space<vmem>>, vector<32x128xf32>
    %1 = arith.truncf %0 : vector<32x128xf32> to vector<32x128xbf16>
    %c0_1 = arith.constant 0 : index
    %c0_2 = arith.constant 0 : index
    %2 = vector.load %arg4[%c0_1, %c0_2] : memref<128x384xbf16, #tpu.memory_space<vmem>>, vector<128x384xbf16>
    %cst = arith.constant dense<0.000000e+00> : vector<32x384xf32>
    %3 = tpu.matmul %1, %2, %cst {dimension_numbers = #tpu.dot_dimension_numbers<[1], [0], [0], [1], [0, 0, 1, 1], [], []>} : vector<32x128xbf16>, vector<128x384xbf16>, vector<32x384xf32> -> vector<32x384xf32>
    %c0_3 = arith.constant 0 : index
    %c0_4 = arith.constant 0 : index
    %4 = vector.load %arg5[%c0_3, %c0_4] : memref<1x384xf32, #tpu.memory_space<vmem>>, vector<1x384xf32>
    %5 = vector.broadcast %4 : vector<1x384xf32> to vector<32x384xf32>
    %6 = arith.addf %3, %5 : vector<32x384xf32>
    %7 = arith.truncf %6 : vector<32x384xf32> to vector<32x384xbf16>
    %c0_5 = arith.constant 0 : index
    %c0_6 = arith.constant 0 : index
    %8 = vector.load %arg6[%c0_5, %c0_6] : memref<32x384xbf16, #tpu.memory_space<vmem>>, vector<32x384xbf16>
    tpu.vector_store %arg6[%c0_5, %c0_6], %7 {strides = array<i32>} : memref<32x384xbf16, #tpu.memory_space<vmem>>, vector<32x384xbf16>,
    return
  }
  func.func @transform_0(%arg0: i32, %arg1: i32, %arg2: i32) -> (i32, i32) {
    %c0_i32 = arith.constant 0 : i32
    return %arg0, %arg2 : i32, i32
  }
  func.func @transform_1(%arg0: i32, %arg1: i32, %arg2: i32) -> (i32, i32) {
    %c0_i32 = arith.constant 0 : i32
    return %arg2, %arg1 : i32, i32
  }
  func.func @transform_2(%arg0: i32, %arg1: i32, %arg2: i32) -> (i32, i32) {
    %c0_i32 = arith.constant 0 : i32
    %c0_i32_0 = arith.constant 0 : i32
    return %c0_i32, %arg1 : i32, i32
  }
  func.func @transform_3(%arg0: i32, %arg1: i32, %arg2: i32) -> (i32, i32) {
    %c0_i32 = arith.constant 0 : i32
    return %arg0, %arg1 : i32, i32
  }
}

module attributes {stable_mosaic.version = 11 : i64} {
  func.func @_gemm_kernel(%arg0: i32, %arg1: i32, %arg2: i32, %arg3: memref<32x128xf32, #tpu.memory_space<vmem>>, %arg4: memref<128x128xbf16, #tpu.memory_space<vmem>>, %arg5: memref<1x128xf32, #tpu.memory_space<vmem>>, %arg6: memref<32x128xbf16, #tpu.memory_space<vmem>>) attributes {dimension_semantics = [#tpu.dimension_semantics<parallel>, #tpu.dimension_semantics<parallel>, #tpu.dimension_semantics<arbitrary>], iteration_bounds = array<i64: 1, 1, 1>, scalar_prefetch = 0 : i64, scratch_operands = 0 : i64, tpu.core_type = #tpu.core_type<tc>, window_params = [{transform_indices = @transform_0, window_bounds = array<i64: 32, 128>}, {transform_indices = @transform_1, window_bounds = array<i64: 128, 128>}, {transform_indices = @transform_2, window_bounds = array<i64: 1, 128>}, {transform_indices = @transform_3, window_bounds = array<i64: 32, 128>}]} {
    %c0 = arith.constant 0 : index
    %c0_0 = arith.constant 0 : index
    %0 = vector.load %arg3[%c0, %c0_0] : memref<32x128xf32, #tpu.memory_space<vmem>>, vector<32x128xf32>
    %1 = arith.truncf %0 : vector<32x128xf32> to vector<32x128xbf16>
    %c0_1 = arith.constant 0 : index
    %c0_2 = arith.constant 0 : index
    %2 = vector.load %arg4[%c0_1, %c0_2] : memref<128x128xbf16, #tpu.memory_space<vmem>>, vector<128x128xbf16>
    %cst = arith.constant dense<0.000000e+00> : vector<32x128xf32>
    %3 = tpu.matmul %1, %2, %cst {dimension_numbers = #tpu.dot_dimension_numbers<[1], [0], [0], [1], [0, 0, 1, 1], [], []>} : vector<32x128xbf16>, vector<128x128xbf16>, vector<32x128xf32> -> vector<32x128xf32>
    %c0_3 = arith.constant 0 : index
    %c0_4 = arith.constant 0 : index
    %4 = vector.load %arg5[%c0_3, %c0_4] : memref<1x128xf32, #tpu.memory_space<vmem>>, vector<1x128xf32>
    %5 = vector.broadcast %4 : vector<1x128xf32> to vector<32x128xf32>
    %6 = arith.addf %3, %5 : vector<32x128xf32>
    %cst_5 = arith.constant 0.000000e+00 : f32
    %7 = vector.broadcast %cst_5 : f32 to vector<32x128xf32>
    %8 = arith.maximumf %6, %7 : vector<32x128xf32>
    %9 = arith.truncf %8 : vector<32x128xf32> to vector<32x128xbf16>
    %c0_6 = arith.constant 0 : index
    %c0_7 = arith.constant 0 : index
    %10 = vector.load %arg6[%c0_6, %c0_7] : memref<32x128xbf16, #tpu.memory_space<vmem>>, vector<32x128xbf16>
    tpu.vector_store %arg6[%c0_6, %c0_7], %9 {strides = array<i32>} : memref<32x128xbf16, #tpu.memory_space<vmem>>, vector<32x128xbf16>,
    return
  }
  func.func @transform_0(%arg0: i32, %arg1: i32, %arg2: i32) -> (i32, i32) {
    %c0_i32 = arith.constant 0 : i32
    return %arg0, %arg2 : i32, i32
  }
  func.func @transform_1(%arg0: i32, %arg1: i32, %arg2: i32) -> (i32, i32) {
    %c0_i32 = arith.constant 0 : i32
    return %arg2, %arg1 : i32, i32
  }
  func.func @transform_2(%arg0: i32, %arg1: i32, %arg2: i32) -> (i32, i32) {
    %c0_i32 = arith.constant 0 : i32
    %c0_i32_0 = arith.constant 0 : i32
    return %c0_i32, %arg1 : i32, i32
  }
  func.func @transform_3(%arg0: i32, %arg1: i32, %arg2: i32) -> (i32, i32) {
    %c0_i32 = arith.constant 0 : i32
    return %arg0, %arg1 : i32, i32
  }
}

module attributes {stable_mosaic.version = 11 : i64} {
  func.func @_attention_kernel(%arg0: i32, %arg1: memref<1x16x128xbf16, #tpu.memory_space<vmem>>, %arg2: memref<1x16x128xbf16, #tpu.memory_space<vmem>>, %arg3: memref<1x16x128xbf16, #tpu.memory_space<vmem>>, %arg4: memref<1x16x128xbf16, #tpu.memory_space<vmem>>) attributes {dimension_semantics = [#tpu.dimension_semantics<parallel>], iteration_bounds = array<i64: 2>, scalar_prefetch = 0 : i64, scratch_operands = 0 : i64, tpu.core_type = #tpu.core_type<tc>, window_params = [{transform_indices = @transform_0, window_bounds = array<i64: 1, 16, 128>}, {transform_indices = @transform_1, window_bounds = array<i64: 1, 16, 128>}, {transform_indices = @transform_2, window_bounds = array<i64: 1, 16, 128>}, {transform_indices = @transform_3, window_bounds = array<i64: 1, 16, 128>}]} {
    %c0 = arith.constant 0 : index
    %c0_0 = arith.constant 0 : index
    %c0_1 = arith.constant 0 : index
    %0 = vector.load %arg1[%c0, %c0_0, %c0_1] : memref<1x16x128xbf16, #tpu.memory_space<vmem>>, vector<1x16x128xbf16>
    %1 = vector.shape_cast %0 : vector<1x16x128xbf16> to vector<16x128xbf16>
    %c0_2 = arith.constant 0 : index
    %c0_3 = arith.constant 0 : index
    %c0_4 = arith.constant 0 : index
    %2 = vector.load %arg2[%c0_2, %c0_3, %c0_4] : memref<1x16x128xbf16, #tpu.memory_space<vmem>>, vector<1x16x128xbf16>
    %3 = vector.shape_cast %2 : vector<1x16x128xbf16> to vector<16x128xbf16>
    %c0_5 = arith.constant 0 : index
    %c0_6 = arith.constant 0 : index
    %c0_7 = arith.constant 0 : index
    %4 = vector.load %arg3[%c0_5, %c0_6, %c0_7] : memref<1x16x128xbf16, #tpu.memory_space<vmem>>, vector<1x16x128xbf16>
    %5 = vector.shape_cast %4 : vector<1x16x128xbf16> to vector<16x128xbf16>
    %6 = tpu.iota {dimensions = array<i32: 1>} : vector<16x16xi32>
    %c8_i32 = arith.constant 8 : i32
    %7 = vector.broadcast %c8_i32 : i32 to vector<16x16xi32>
    %8 = arith.cmpi slt, %6, %7 : vector<16x16xi32>
    %9 = vector.extract_strided_slice %1 {offsets = [0, 0], sizes = [16, 8], strides = [1, 1]} : vector<16x128xbf16> to vector<16x8xbf16>
    %10 = vector.extract_strided_slice %3 {offsets = [0, 0], sizes = [16, 8], strides = [1, 1]} : vector<16x128xbf16> to vector<16x8xbf16>
    %11 = vector.extract_strided_slice %5 {offsets = [0, 0], sizes = [16, 8], strides = [1, 1]} : vector<16x128xbf16> to vector<16x8xbf16>
    %cst = arith.constant dense<0.000000e+00> : vector<16x16xf32>
    %12 = tpu.matmul %9, %10, %cst {dimension_numbers = #tpu.dot_dimension_numbers<[1], [1], [0], [0], [0, 0, 1, 0], [], []>} : vector<16x8xbf16>, vector<16x8xbf16>, vector<16x16xf32> -> vector<16x16xf32>
    %cst_8 = arith.constant 0xFF800000 : f32
    %13 = vector.broadcast %cst_8 : f32 to vector<16x16xf32>
    %14 = arith.select %8, %12, %13 : vector<16x16xi1>, vector<16x16xf32>
    %cst_9 = arith.constant dense<0xFF800000> : vector<16xf32>
    %15 = vector.multi_reduction <maximumf>, %14, %cst_9 [1] : vector<16x16xf32> to vector<16xf32>
    %16 = vector.shape_cast %15 : vector<16xf32> to vector<16x1xf32>
    %17 = vector.broadcast %16 : vector<16x1xf32> to vector<16x16xf32>
    %18 = arith.subf %14, %17 : vector<16x16xf32>
    %19 = math.exp %18 : vector<16x16xf32>
    %cst_10 = arith.constant dense<0.000000e+00> : vector<16xf32>
    %20 = vector.multi_reduction <add>, %19, %cst_10 [1] : vector<16x16xf32> to vector<16xf32>
    %21 = vector.shape_cast %20 : vector<16xf32> to vector<16x1xf32>
    %22 = arith.truncf %19 : vector<16x16xf32> to vector<16x16xbf16>
    %cst_11 = arith.constant dense<0.000000e+00> : vector<16x8xf32>
    %23 = tpu.matmul %22, %11, %cst_11 {dimension_numbers = #tpu.dot_dimension_numbers<[1], [0], [0], [1], [0, 0, 1, 1], [], []>} : vector<16x16xbf16>, vector<16x8xbf16>, vector<16x8xf32> -> vector<16x8xf32>
    %24 = tpu.reciprocal %21 {approx = true} : vector<16x1xf32> -> vector<16x1xf32>
    %25 = vector.broadcast %24 : vector<16x1xf32> to vector<16x8xf32>
    %26 = arith.mulf %23, %25 : vector<16x8xf32>
    %27 = vector.extract_strided_slice %1 {offsets = [0, 8], sizes = [16, 8], strides = [1, 1]} : vector<16x128xbf16> to vector<16x8xbf16>
    %28 = vector.extract_strided_slice %3 {offsets = [0, 8], sizes = [16, 8], strides = [1, 1]} : vector<16x128xbf16> to vector<16x8xbf16>
    %29 = vector.extract_strided_slice %5 {offsets = [0, 8], sizes = [16, 8], strides = [1, 1]} : vector<16x128xbf16> to vector<16x8xbf16>
    %cst_12 = arith.constant dense<0.000000e+00> : vector<16x16xf32>
    %30 = tpu.matmul %27, %28, %cst_12 {dimension_numbers = #tpu.dot_dimension_numbers<[1], [1], [0], [0], [0, 0, 1, 0], [], []>} : vector<16x8xbf16>, vector<16x8xbf16>, vector<16x16xf32> -> vector<16x16xf32>
    %cst_13 = arith.constant 0xFF800000 : f32
    %31 = vector.broadcast %cst_13 : f32 to vector<16x16xf32>
    %32 = arith.select %8, %30, %31 : vector<16x16xi1>, vector<16x16xf32>
    %cst_14 = arith.constant dense<0xFF800000> : vector<16xf32>
    %33 = vector.multi_reduction <maximumf>, %32, %cst_14 [1] : vector<16x16xf32> to vector<16xf32>
    %34 = vector.shape_cast %33 : vector<16xf32> to vector<16x1xf32>
    %35 = vector.broadcast %34 : vector<16x1xf32> to vector<16x16xf32>
    %36 = arith.subf %32, %35 : vector<16x16xf32>
    %37 = math.exp %36 : vector<16x16xf32>
    %cst_15 = arith.constant dense<0.000000e+00> : vector<16xf32>
    %38 = vector.multi_reduction <add>, %37, %cst_15 [1] : vector<16x16xf32> to vector<16xf32>
    %39 = vector.shape_cast %38 : vector<16xf32> to vector<16x1xf32>
    %40 = arith.truncf %37 : vector<16x16xf32> to vector<16x16xbf16>
    %cst_16 = arith.constant dense<0.000000e+00> : vector<16x8xf32>
    %41 = tpu.matmul %40, %29, %cst_16 {dimension_numbers = #tpu.dot_dimension_numbers<[1], [0], [0], [1], [0, 0, 1, 1], [], []>} : vector<16x16xbf16>, vector<16x8xbf16>, vector<16x8xf32> -> vector<16x8xf32>
    %42 = tpu.reciprocal %39 {approx = true} : vector<16x1xf32> -> vector<16x1xf32>
    %43 = vector.broadcast %42 : vector<16x1xf32> to vector<16x8xf32>
    %44 = arith.mulf %41, %43 : vector<16x8xf32>
    %45 = vector.extract_strided_slice %1 {offsets = [0, 16], sizes = [16, 8], strides = [1, 1]} : vector<16x128xbf16> to vector<16x8xbf16>
    %46 = vector.extract_strided_slice %3 {offsets = [0, 16], sizes = [16, 8], strides = [1, 1]} : vector<16x128xbf16> to vector<16x8xbf16>
    %47 = vector.extract_strided_slice %5 {offsets = [0, 16], sizes = [16, 8], strides = [1, 1]} : vector<16x128xbf16> to vector<16x8xbf16>
    %cst_17 = arith.constant dense<0.000000e+00> : vector<16x16xf32>
    %48 = tpu.matmul %45, %46, %cst_17 {dimension_numbers = #tpu.dot_dimension_numbers<[1], [1], [0], [0], [0, 0, 1, 0], [], []>} : vector<16x8xbf16>, vector<16x8xbf16>, vector<16x16xf32> -> vector<16x16xf32>
    %cst_18 = arith.constant 0xFF800000 : f32
    %49 = vector.broadcast %cst_18 : f32 to vector<16x16xf32>
    %50 = arith.select %8, %48, %49 : vector<16x16xi1>, vector<16x16xf32>
    %cst_19 = arith.constant dense<0xFF800000> : vector<16xf32>
    %51 = vector.multi_reduction <maximumf>, %50, %cst_19 [1] : vector<16x16xf32> to vector<16xf32>
    %52 = vector.shape_cast %51 : vector<16xf32> to vector<16x1xf32>
    %53 = vector.broadcast %52 : vector<16x1xf32> to vector<16x16xf32>
    %54 = arith.subf %50, %53 : vector<16x16xf32>
    %55 = math.exp %54 : vector<16x16xf32>
    %cst_20 = arith.constant dense<0.000000e+00> : vector<16xf32>
    %56 = vector.multi_reduction <add>, %55, %cst_20 [1] : vector<16x16xf32> to vector<16xf32>
    %57 = vector.shape_cast %56 : vector<16xf32> to vector<16x1xf32>
    %58 = arith.truncf %55 : vector<16x16xf32> to vector<16x16xbf16>
    %cst_21 = arith.constant dense<0.000000e+00> : vector<16x8xf32>
    %59 = tpu.matmul %58, %47, %cst_21 {dimension_numbers = #tpu.dot_dimension_numbers<[1], [0], [0], [1], [0, 0, 1, 1], [], []>} : vector<16x16xbf16>, vector<16x8xbf16>, vector<16x8xf32> -> vector<16x8xf32>
    %60 = tpu.reciprocal %57 {approx = true} : vector<16x1xf32> -> vector<16x1xf32>
    %61 = vector.broadcast %60 : vector<16x1xf32> to vector<16x8xf32>
    %62 = arith.mulf %59, %61 : vector<16x8xf32>
    %63 = vector.extract_strided_slice %1 {offsets = [0, 24], sizes = [16, 8], strides = [1, 1]} : vector<16x128xbf16> to vector<16x8xbf16>
    %64 = vector.extract_strided_slice %3 {offsets = [0, 24], sizes = [16, 8], strides = [1, 1]} : vector<16x128xbf16> to vector<16x8xbf16>
    %65 = vector.extract_strided_slice %5 {offsets = [0, 24], sizes = [16, 8], strides = [1, 1]} : vector<16x128xbf16> to vector<16x8xbf16>
    %cst_22 = arith.constant dense<0.000000e+00> : vector<16x16xf32>
    %66 = tpu.matmul %63, %64, %cst_22 {dimension_numbers = #tpu.dot_dimension_numbers<[1], [1], [0], [0], [0, 0, 1, 0], [], []>} : vector<16x8xbf16>, vector<16x8xbf16>, vector<16x16xf32> -> vector<16x16xf32>
    %cst_23 = arith.constant 0xFF800000 : f32
    %67 = vector.broadcast %cst_23 : f32 to vector<16x16xf32>
    %68 = arith.select %8, %66, %67 : vector<16x16xi1>, vector<16x16xf32>
    %cst_24 = arith.constant dense<0xFF800000> : vector<16xf32>
    %69 = vector.multi_reduction <maximumf>, %68, %cst_24 [1] : vector<16x16xf32> to vector<16xf32>
    %70 = vector.shape_cast %69 : vector<16xf32> to vector<16x1xf32>
    %71 = vector.broadcast %70 : vector<16x1xf32> to vector<16x16xf32>
    %72 = arith.subf %68, %71 : vector<16x16xf32>
    %73 = math.exp %72 : vector<16x16xf32>
    %cst_25 = arith.constant dense<0.000000e+00> : vector<16xf32>
    %74 = vector.multi_reduction <add>, %73, %cst_25 [1] : vector<16x16xf32> to vector<16xf32>
    %75 = vector.shape_cast %74 : vector<16xf32> to vector<16x1xf32>
    %76 = arith.truncf %73 : vector<16x16xf32> to vector<16x16xbf16>
    %cst_26 = arith.constant dense<0.000000e+00> : vector<16x8xf32>
    %77 = tpu.matmul %76, %65, %cst_26 {dimension_numbers = #tpu.dot_dimension_numbers<[1], [0], [0], [1], [0, 0, 1, 1], [], []>} : vector<16x16xbf16>, vector<16x8xbf16>, vector<16x8xf32> -> vector<16x8xf32>
    %78 = tpu.reciprocal %75 {approx = true} : vector<16x1xf32> -> vector<16x1xf32>
    %79 = vector.broadcast %78 : vector<16x1xf32> to vector<16x8xf32>
    %80 = arith.mulf %77, %79 : vector<16x8xf32>
    %cst_27 = arith.constant 0.000000e+00 : f32
    %81 = vector.broadcast %cst_27 : f32 to vector<16x96xf32>
    %82 = tpu.concatenate %26, %44, %62, %80, %81 in 1 : vector<16x8xf32>, vector<16x8xf32>, vector<16x8xf32>, vector<16x8xf32>, vector<16x96xf32> -> vector<16x128xf32>
    %83 = arith.truncf %82 : vector<16x128xf32> to vector<16x128xbf16>
    %c0_28 = arith.constant 0 : index
    %c0_29 = arith.constant 0 : index
    %c0_30 = arith.constant 0 : index
    %84 = vector.load %arg4[%c0_28, %c0_29, %c0_30] : memref<1x16x128xbf16, #tpu.memory_space<vmem>>, vector<1x16x128xbf16>
    %85 = vector.shape_cast %84 : vector<1x16x128xbf16> to vector<16x128xbf16>
    %86 = vector.shape_cast %83 : vector<16x128xbf16> to vector<1x16x128xbf16>
    tpu.vector_store %arg4[%c0_28, %c0_29, %c0_30], %86 {strides = array<i32>} : memref<1x16x128xbf16, #tpu.memory_space<vmem>>, vector<1x16x128xbf16>,
    return
  }
  func.func @transform_0(%arg0: i32) -> (i32, i32, i32) {
    %c0_i32 = arith.constant 0 : i32
    %c0_i32_0 = arith.constant 0 : i32
    %c0_i32_1 = arith.constant 0 : i32
    return %arg0, %c0_i32, %c0_i32_0 : i32, i32, i32
  }
  func.func @transform_1(%arg0: i32) -> (i32, i32, i32) {
    %c0_i32 = arith.constant 0 : i32
    %c1_i32 = arith.constant 1 : i32
    %c0_i32_0 = arith.constant 0 : i32
    return %arg0, %c0_i32, %c1_i32 : i32, i32, i32
  }
  func.func @transform_2(%arg0: i32) -> (i32, i32, i32) {
    %c0_i32 = arith.constant 0 : i32
    %c2_i32 = arith.constant 2 : i32
    %c0_i32_0 = arith.constant 0 : i32
    return %arg0, %c0_i32, %c2_i32 : i32, i32, i32
  }
  func.func @transform_3(%arg0: i32) -> (i32, i32, i32) {
    %c0_i32 = arith.constant 0 : i32
    %c0_i32_0 = arith.constant 0 : i32
    %c0_i32_1 = arith.constant 0 : i32
    return %arg0, %c0_i32, %c0_i32_0 : i32, i32, i32
  }
}

module attributes {stable_mosaic.version = 11 : i64} {
  func.func @_gemm_kernel(%arg0: i32, %arg1: i32, %arg2: i32, %arg3: memref<32x128xbf16, #tpu.memory_space<vmem>>, %arg4: memref<128x128xbf16, #tpu.memory_space<vmem>>, %arg5: memref<1x128xf32, #tpu.memory_space<vmem>>, %arg6: memref<32x128xf32, #tpu.memory_space<vmem>>, %arg7: memref<1x128xf32, #tpu.memory_space<vmem>>, %arg8: memref<1x128xf32, #tpu.memory_space<vmem>>, %arg9: memref<32x128xf32, #tpu.memory_space<vmem>>) attributes {dimension_semantics = [#tpu.dimension_semantics<parallel>, #tpu.dimension_semantics<parallel>, #tpu.dimension_semantics<arbitrary>], iteration_bounds = array<i64: 1, 1, 1>, scalar_prefetch = 0 : i64, scratch_operands = 0 : i64, tpu.core_type = #tpu.core_type<tc>, window_params = [{transform_indices = @transform_0, window_bounds = array<i64: 32, 128>}, {transform_indices = @transform_1, window_bounds = array<i64: 128, 128>}, {transform_indices = @transform_2, window_bounds = array<i64: 1, 128>}, {transform_indices = @transform_3, window_bounds = array<i64: 32, 128>}, {transform_indices = @transform_4, window_bounds = array<i64: 1, 128>}, {transform_indices = @transform_5, window_bounds = array<i64: 1, 128>}, {transform_indices = @transform_6, window_bounds = array<i64: 32, 128>}]} {
    %c0 = arith.constant 0 : index
    %c0_0 = arith.constant 0 : index
    %0 = vector.load %arg3[%c0, %c0_0] : memref<32x128xbf16, #tpu.memory_space<vmem>>, vector<32x128xbf16>
    %c0_1 = arith.constant 0 : index
    %c0_2 = arith.constant 0 : index
    %1 = vector.load %arg4[%c0_1, %c0_2] : memref<128x128xbf16, #tpu.memory_space<vmem>>, vector<128x128xbf16>
    %cst = arith.constant dense<0.000000e+00> : vector<32x128xf32>
    %2 = tpu.matmul %0, %1, %cst {dimension_numbers = #tpu.dot_dimension_numbers<[1], [0], [0], [1], [0, 0, 1, 1], [], []>} : vector<32x128xbf16>, vector<128x128xbf16>, vector<32x128xf32> -> vector<32x128xf32>
    %c0_3 = arith.constant 0 : index
    %c0_4 = arith.constant 0 : index
    %3 = vector.load %arg5[%c0_3, %c0_4] : memref<1x128xf32, #tpu.memory_space<vmem>>, vector<1x128xf32>
    %4 = vector.broadcast %3 : vector<1x128xf32> to vector<32x128xf32>
    %5 = arith.addf %2, %4 : vector<32x128xf32>
    %c0_5 = arith.constant 0 : index
    %c0_6 = arith.constant 0 : index
    %6 = vector.load %arg6[%c0_5, %c0_6] : memref<32x128xf32, #tpu.memory_space<vmem>>, vector<32x128xf32>
    %7 = arith.addf %5, %6 : vector<32x128xf32>
    %8 = tpu.iota {dimensions = array<i32: 1>} : vector<32x128xi32>
    %c32_i32 = arith.constant 32 : i32
    %9 = vector.broadcast %c32_i32 : i32 to vector<32x128xi32>
    %10 = arith.cmpi slt, %8, %9 : vector<32x128xi32>
    %cst_7 = arith.constant 0.000000e+00 : f32
    %11 = vector.broadcast %cst_7 : f32 to vector<32x128xf32>
    %12 = arith.select %10, %7, %11 : vector<32x128xi1>, vector<32x128xf32>
    %cst_8 = arith.constant dense<0.000000e+00> : vector<32xf32>
    %13 = vector.multi_reduction <add>, %12, %cst_8 [1] : vector<32x128xf32> to vector<32xf32>
    %14 = vector.shape_cast %13 : vector<32xf32> to vector<32x1xf32>
    %cst_9 = arith.constant 3.125000e-02 : f32
    %15 = vector.broadcast %cst_9 : f32 to vector<32x1xf32>
    %16 = arith.mulf %14, %15 : vector<32x1xf32>
    %17 = vector.broadcast %16 : vector<32x1xf32> to vector<32x128xf32>
    %18 = arith.subf %7, %17 : vector<32x128xf32>
    %cst_10 = arith.constant 0.000000e+00 : f32
    %19 = vector.broadcast %cst_10 : f32 to vector<32x128xf32>
    %20 = arith.select %10, %18, %19 : vector<32x128xi1>, vector<32x128xf32>
    %21 = arith.mulf %20, %20 : vector<32x128xf32>
    %cst_11 = arith.constant dense<0.000000e+00> : vector<32xf32>
    %22 = vector.multi_reduction <add>, %21, %cst_11 [1] : vector<32x128xf32> to vector<32xf32>
    %23 = vector.shape_cast %22 : vector<32xf32> to vector<32x1xf32>
    %cst_12 = arith.constant 3.125000e-02 : f32
    %24 = vector.broadcast %cst_12 : f32 to vector<32x1xf32>
    %25 = arith.mulf %23, %24 : vector<32x1xf32>
    %cst_13 = arith.constant 9.99999974E-6 : f32
    %26 = vector.broadcast %cst_13 : f32 to vector<32x1xf32>
    %27 = arith.addf %25, %26 : vector<32x1xf32>
    %28 = math.rsqrt %27 : vector<32x1xf32>
    %29 = vector.broadcast %28 : vector<32x1xf32> to vector<32x128xf32>
    %30 = arith.mulf %20, %29 : vector<32x128xf32>
    %c0_14 = arith.constant 0 : index
    %c0_15 = arith.constant 0 : index
    %31 = vector.load %arg7[%c0_14, %c0_15] : memref<1x128xf32, #tpu.memory_space<vmem>>, vector<1x128xf32>
    %32 = vector.broadcast %31 : vector<1x128xf32> to vector<32x128xf32>
    %33 = arith.mulf %30, %32 : vector<32x128xf32>
    %c0_16 = arith.constant 0 : index
    %c0_17 = arith.constant 0 : index
    %34 = vector.load %arg8[%c0_16, %c0_17] : memref<1x128xf32, #tpu.memory_space<vmem>>, vector<1x128xf32>
    %35 = vector.broadcast %34 : vector<1x128xf32> to vector<32x128xf32>
    %36 = arith.addf %33, %35 : vector<32x128xf32>
    %c0_18 = arith.constant 0 : index
    %c0_19 = arith.constant 0 : index
    %37 = vector.load %arg9[%c0_18, %c0_19] : memref<32x128xf32, #tpu.memory_space<vmem>>, vector<32x128xf32>
    tpu.vector_store %arg9[%c0_18, %c0_19], %36 {strides = array<i32>} : memref<32x128xf32, #tpu.memory_space<vmem>>, vector<32x128xf32>,
    return
  }
  func.func @transform_0(%arg0: i32, %arg1: i32, %arg2: i32) -> (i32, i32) {
    %c0_i32 = arith.constant 0 : i32
    return %arg0, %arg2 : i32, i32
  }
  func.func @transform_1(%arg0: i32, %arg1: i32, %arg2: i32) -> (i32, i32) {
    %c0_i32 = arith.constant 0 : i32
    return %arg2, %arg1 : i32, i32
  }
  func.func @transform_2(%arg0: i32, %arg1: i32, %arg2: i32) -> (i32, i32) {
    %c0_i32 = arith.constant 0 : i32
    %c0_i32_0 = arith.constant 0 : i32
    return %c0_i32, %arg1 : i32, i32
  }
  func.func @transform_3(%arg0: i32, %arg1: i32, %arg2: i32) -> (i32, i32) {
    %c0_i32 = arith.constant 0 : i32
    return %arg0, %arg1 : i32, i32
  }
  func.func @transform_4(%arg0: i32, %arg1: i32, %arg2: i32) -> (i32, i32) {
    %c0_i32 = arith.constant 0 : i32
    %c0_i32_0 = arith.constant 0 : i32
    return %c0_i32, %arg1 : i32, i32
  }
  func.func @transform_5(%arg0: i32, %arg1: i32, %arg2: i32) -> (i32, i32) {
    %c0_i32 = arith.constant 0 : i32
    %c0_i32_0 = arith.constant 0 : i32
    return %c0_i32, %arg1 : i32, i32
  }
  func.func @transform_6(%arg0: i32, %arg1: i32, %arg2: i32) -> (i32, i32) {
    %c0_i32 = arith.constant 0 : i32
    return %arg0, %arg1 : i32, i32
  }
}

</mosaic_0001>

<bundles_post_ra>
// kernel: transformer_encoder_layer.8
= control target key start
LH: loop header
LB: loop body
LE: loop exit
PB: predicated region body
PF: predicated region fallthrough
CT: control target
= control target key end

     0   :  { %s300_s1 = inlined_call_operand.vmem [shape: bf16[128,128], index: 1, kind: input, shape index: {}]   ;;  %s301_s0 = inlined_call_operand.vmem [shape: f32[32,128], index: 0, kind: input, shape index: {}]   ;;  %s302_s2 = inlined_call_operand.vmem [shape: f32[1,128], index: 2, kind: input, shape index: {}]   ;;  %s303_s3 = inlined_call_operand.vmem [shape: bf16[32,128], index: 3, kind: output, shape index: {}]  }
   0x1   :  { %v227_v0 = vld [vmem:[%s300_s1] sm:$0xff]   ;;  %v228_v1 = vld [vmem:[%s300_s1 + $0x8] sm:$0xff]   ;;  %v229_v2 = vld [vmem:[%s300_s1 + $0x10] sm:$0xff]  }
   0x2   :  { %207 = vmatprep.subr.bf16.mxu0 %v227_v0  ;;  %v230_v3 = vld [vmem:[%s300_s1 + $0x18] sm:$0xff]   ;;  %v15_v4 = vld [vmem:[%s301_s0] sm:$0xff]  ;;  %v16_v5 = vld [vmem:[%s301_s0 + $0x8] sm:$0xff] }
   0x3   :  { %208 = vmatpush3.bf16.msra.mxu0 %v227_v0  ;;  %v19_v6 = vpack.c.bf16 %v16_v5, %v15_v4  ;;  %v231_v7 = vld [vmem:[%s300_s1 + $0x20] sm:$0xff]   ;;  %v232_v8 = vld [vmem:[%s300_s1 + $0x28] sm:$0xff]   ;;  %v233_v9 = vld [vmem:[%s300_s1 + $0x30] sm:$0xff]  }
   0x4   :  { %209 = vmatprep.subr.bf16.mxu0 %v228_v1  ;;  %v234_v10 = vld [vmem:[%s300_s1 + $0x38] sm:$0xff]   ;;  %v17_v11 = vld [vmem:[%s301_s0 + $0x10] sm:$0xff]  ;;  %v169_v14 = vld [vmem:[%s302_s2] ss:$0 sm:$0xff] }
   0x5   :  { %223 = vmatprep.mubr.bf16.mxu0 %v19_v6  ;;  %v18_v12 = vld [vmem:[%s301_s0 + $0x18] sm:$0xff] }
   0x6   :  { %v20_v13 = vpack.c.bf16 %v18_v12, %v17_v11 }
   0x7   :  { %210 = vmatpush3.bf16.msra.mxu0 %v228_v1 }
   0x8   :  { %211 = vmatprep.subr.bf16.mxu0 %v229_v2 }
   0xb   :  { %212 = vmatpush3.bf16.msra.mxu0 %v229_v2 }
   0xc   :  { %213 = vmatprep.subr.bf16.mxu0 %v230_v3 }
   0xf   :  { %214 = vmatpush3.bf16.msra.mxu0 %v230_v3 }
  0x10   :  { %215 = vmatprep.subr.bf16.mxu0 %v231_v7 }
  0x13   :  { %216 = vmatpush3.bf16.msra.mxu0 %v231_v7 }
  0x14   :  { %217 = vmatprep.subr.bf16.mxu0 %v232_v8 }
  0x17   :  { %218 = vmatpush3.bf16.msra.mxu0 %v232_v8 }
  0x18   :  { %219 = vmatprep.subr.bf16.mxu0 %v233_v9 }
  0x1b   :  { %220 = vmatpush3.bf16.msra.mxu0 %v233_v9 }
  0x1c   :  { %221 = vmatprep.subr.bf16.mxu0 %v234_v10 }
  0x1f   :  { %222 = vmatpush3.bf16.msra.mxu0 %v234_v10 }
  0x22   :  { %224 = vmatmul.mubr.bf16.vlgmr.msra.gmra.mrb[0].mxu0 %v20_v13 }
  0xf5   :  { %v225_v15 = vpop.f32.mrb[0].mxu0 }
  0xf6   :  { %v135_v16 = vadd.f32 %v225_v15, %v169_v14  ;;  %v126_v17 = vpop.f32.mrb[1].mxu0 }
  0xf7   :  { %v127_v18 = vadd.f32 %v169_v14, %v126_v17  ;;  %v226_v19 = vpop.f32.mrb[2].mxu0 }
  0xf8   :  { %v138_v20 = vadd.f32 %v226_v19, %v169_v14  ;;  %v129_v21 = vpop.f32.mrb[3].mxu0  ;;  %v143_v23 = vmax.f32 %v135_v16, 0.0 }
  0xf9   :  { %v130_v22 = vadd.f32 %v169_v14, %v129_v21  ;;  %v141_v25 = vmax.f32 %v127_v18, 0.0 }
  0xfa   :  { %v144_v24 = vmax.f32 %v138_v20, 0.0 }
  0xfb   :  { %v142_v26 = vmax.f32 %v130_v22, 0.0 }
  0xfc   :  { %v194_v27 = vpack.c.bf16 %v144_v24, %v143_v23 }
  0xfd   :  { %v189_v28 = vpack.c.bf16 %v142_v26, %v141_v25 }
  0xfe   :  { %196 = vst [vmem:[%s303_s3 + $0x8] sm:$0xff] %v194_v27  }
  0xff   :  { %190 = vst [vmem:[%s303_s3] sm:$0xff] %v189_v28  }

// kernel: transformer_encoder_layer.5
= control target key start
LH: loop header
LB: loop body
LE: loop exit
PB: predicated region body
PF: predicated region fallthrough
CT: control target
= control target key end

     0   :  { %8 = vsyncpa [#allocation3], 0  ;;  %s497_s12 = smov [#allocation2]   ;;  %s574_s0 = inlined_call_operand.vmem [shape: f32[32,128], index: 0, kind: input, shape index: {}]   ;;  %s575_s1 = inlined_call_operand.hbm [shape: bf16[128,384], index: 1, kind: input, shape index: {}]   ;;  %s576_s2 = inlined_call_operand.vmem [shape: f32[1,384], index: 2, kind: input, shape index: {}]   ;;  %s577_s3 = inlined_call_operand.vmem [shape: bf16[32,384], index: 3, kind: output, shape index: {}]  }
   0x1   :  { %s16_s13 = sshll.u32 %s497_s12, 4  ;;  %s473_s16 = scalar_lea.hbm %s575_s1, 3072  ;;  %s17_s13 = int_to_ptr.vmem [resolvable:$true] %s16_s13 }
   0x2   :  { %p474_p0 = scmp.ne.s32.totalorder %s575_s1, %s473_s16  ;;  %p477_p1 = scmp.lt.u32.totalorder %s473_s16, %s575_s1 }
   0x4   :  { %p479_p2 = pnand %p477_p1, %p474_p0 }
   0x6   :  { %482 = shalt.err (!%p479_p2)
}
   0x7   :  { %s483_s21 = scalar_lea.vmem %s17_s13, 3072  ;;  %p488_p4 = scmp.lt.s32.totalorder %s17_s13, %s17_s13 }
   0x8   :  { %p484_p3 = scmp.ne.s32.totalorder %s17_s13, %s483_s21  ;;  %p489_p5 = scmp.lt.s32.totalorder %s483_s21, %s483_s21 }
   0xa   :  { %p490_p6 = por %p489_p5, %p488_p4 }
   0xc   :  { %p491_p7 = pnand %p490_p6, %p484_p3 }
   0xe   :  { %494 = shalt.err (!%p491_p7)
}
   0xf   :  { %s498_s22 = smov 192   ;;  %s499_s23 = smov 12  }
  0x10   :  { %22 = dma.hbm_to_vmem [thread:$0]  %s575_s1, 3072, %s17_s13, [#allocation3], %s498_s22, %s498_s22, %s499_s23  }
  0x11   :  { %495 = dma.done.wait [#allocation3], 3072  }
  0x12   :  { %496 = vsyncadd [#allocation3], 4294964224  ;;  %v500_v0 = vmov 0   ;;  %v441_v1 = vld [vmem:[#allocation2 + $0x4] ss:$12 sps:$4 sm:$0xff]   ;;  %v30_v18 = vld [vmem:[%s574_s0 + $0x8] sm:$0xff]  ;;  %v69_v31 = vlaneseq }
  0x13   :  { %244 = vmatprep.mubr.bf16.mxu0 %v500_v0  ;;  %v443_v2 = vld [vmem:[#allocation2] ss:$12 sps:$4 sm:$0xff]   ;;  %212 = vmatprep.subr.bf16.mxu0 %v441_v1  ;;  %v444_v3 = vld [vmem:[#allocation2 + $0x1c] ss:$12 sps:$4 sm:$0xff]   ;;  %v446_v4 = vld [vmem:[#allocation2 + $0x18] ss:$12 sps:$4 sm:$0xff]  }
  0x14   :  { %213 = vmatpush1.bf16.msra.mxu0 %v443_v2  ;;  %v447_v5 = vld [vmem:[#allocation2 + $0x8] ss:$12 sps:$4 sm:$0xff]   ;;  %v451_v7 = vld [vmem:[#allocation2 + $0x20] ss:$12 sps:$4 sm:$0xff]   ;;  %v450_v8 = vld [vmem:[#allocation2 + $0x30] ss:$12 sps:$4 sm:$0xff]  }
  0x15   :  { %214 = vmatprep.subr.bf16.mxu0 %v444_v3  ;;  %v448_v6 = vld [vmem:[#allocation2 + $0x34] ss:$12 sps:$4 sm:$0xff]   ;;  %417 = vmatprep.subr.bf16.mxu1 %v447_v5  ;;  %v452_v9 = vld [vmem:[#allocation2 + $0x4c] ss:$12 sps:$4 sm:$0xff]   ;;  %v459_v12 = vld [vmem:[#allocation2 + $0x50] ss:$12 sps:$4 sm:$0xff]  }
  0x16   :  { %418 = vmatpush3.bf16.msra.mxu1 %v447_v5  ;;  %v455_v10 = vld [vmem:[#allocation2 + $0x38] ss:$12 sps:$4 sm:$0xff]   ;;  %v454_v11 = vld [vmem:[#allocation2 + $0x48] ss:$12 sps:$4 sm:$0xff]   ;;  %v458_v14 = vld [vmem:[#allocation2 + $0x60] ss:$12 sps:$4 sm:$0xff]  }
  0x17   :  { %419 = vmatprep.subr.bf16.mxu1 %v451_v7  ;;  %v456_v13 = vld [vmem:[#allocation2 + $0x64] ss:$12 sps:$4 sm:$0xff]   ;;  %v463_v15 = vld [vmem:[#allocation2 + $0x68] ss:$12 sps:$4 sm:$0xff]   ;;  %v467_v20 = vld [vmem:[#allocation2 + $0x80] ss:$12 sps:$4 sm:$0xff]  }
  0x18   :  { %215 = vmatpush1.bf16.msra.mxu0 %v446_v4  ;;  %v460_v16 = vld [vmem:[#allocation2 + $0x7c] ss:$12 sps:$4 sm:$0xff]   ;;  %v29_v17 = vld [vmem:[%s574_s0] sm:$0xff]  ;;  %v468_v25 = vld [vmem:[#allocation2 + $0xac] ss:$12 sps:$4 sm:$0xff]   ;;  %v70_v32 = vshrl.u32 %v69_v31, 7 }
  0x19   :  { %216 = vmatprep.subr.bf16.mxu0 %v448_v6  ;;  %v462_v19 = vld [vmem:[#allocation2 + $0x78] ss:$12 sps:$4 sm:$0xff]   ;;  %v33_v21 = vpack.c.bf16 %v30_v18, %v29_v17  ;;  %v464_v22 = vld [vmem:[#allocation2 + $0x94] ss:$12 sps:$4 sm:$0xff]   ;;  %v466_v23 = vld [vmem:[#allocation2 + $0x90] ss:$12 sps:$4 sm:$0xff]  }
  0x1a   :  { %420 = vmatpush3.bf16.msra.mxu1 %v451_v7  ;;  %v471_v24 = vld [vmem:[#allocation2 + $0x98] ss:$12 sps:$4 sm:$0xff]   ;;  %v470_v26 = vld [vmem:[#allocation2 + $0xa8] ss:$12 sps:$4 sm:$0xff]   ;;  %v472_v27 = vld [vmem:[#allocation2 + $0xb0] ss:$12 sps:$4 sm:$0xff]  }
  0x1b   :  { %421 = vmatprep.subr.bf16.mxu1 %v455_v10  ;;  %433 = vmatprep.mubr.bf16.mxu1 %v33_v21  ;;  %v31_v28 = vld [vmem:[%s574_s0 + $0x10] sm:$0xff]  ;;  %v32_v29 = vld [vmem:[%s574_s0 + $0x18] sm:$0xff]  ;;  %v71_v33 = vsub.s32 0, %v70_v32  ;;  %v67_v34 = vld [vmem:[%s576_s2] sm:$0x7]  ;;  %v75_v35 = vsub.s32 1, %v70_v32 }
  0x1c   :  { %217 = vmatpush1.bf16.msra.mxu0 %v450_v8  ;;  %v34_v30 = vpack.c.bf16 %v32_v29, %v31_v28  ;;  %v79_v36 = vsub.s32 2, %v70_v32 }
  0x1d   :  { %218 = vmatprep.subr.bf16.mxu0 %v452_v9  ;;  %v72_v37 = vrot.slane %v67_v34, %v71_v33  ;;  %v76_v38 = vrot.slane %v67_v34, %v75_v35 }
  0x1e   :  { %422 = vmatpush3.bf16.msra.mxu1 %v455_v10  ;;  %v80_v40 = vrot.slane %v67_v34, %v79_v36 }
  0x1f   :  { %423 = vmatprep.subr.bf16.mxu1 %v459_v12 }
  0x20   :  { %219 = vmatpush1.bf16.msra.mxu0 %v454_v11 }
  0x21   :  { %220 = vmatprep.subr.bf16.mxu0 %v456_v13 }
  0x22   :  { %424 = vmatpush3.bf16.msra.mxu1 %v459_v12 }
  0x23   :  { %425 = vmatprep.subr.bf16.mxu1 %v463_v15 }
  0x24   :  { %221 = vmatpush1.bf16.msra.mxu0 %v458_v14 }
  0x25   :  { %222 = vmatprep.subr.bf16.mxu0 %v460_v16 }
  0x26   :  { %426 = vmatpush3.bf16.msra.mxu1 %v463_v15 }
  0x27   :  { %427 = vmatprep.subr.bf16.mxu1 %v467_v20 }
  0x28   :  { %223 = vmatpush1.bf16.msra.mxu0 %v462_v19 }
  0x29   :  { %224 = vmatprep.subr.bf16.mxu0 %v464_v22 }
  0x2a   :  { %428 = vmatpush3.bf16.msra.mxu1 %v467_v20 }
  0x2b   :  { %429 = vmatprep.subr.bf16.mxu1 %v471_v24 }
  0x2c   :  { %225 = vmatpush1.bf16.msra.mxu0 %v466_v23 }
  0x2d   :  { %226 = vmatprep.subr.bf16.mxu0 %v468_v25 }
  0x2e   :  { %430 = vmatpush3.bf16.msra.mxu1 %v471_v24 }
  0x2f   :  { %431 = vmatprep.subr.bf16.mxu1 %v472_v27 }
  0x30   :  { %227 = vmatpush1.bf16.msra.mxu0 %v470_v26 }
  0x32   :  { %432 = vmatpush3.bf16.msra.mxu1 %v472_v27 }
  0x33   :  { %245 = vmatmul.mubr.bf16.vlgmr.msra.gmra.mrb[0].mxu0 %v33_v21 }
  0x34   :  { %254 = vmatprep.mubr.bf16.mxu0 %v500_v0 }
  0x35   :  { %434 = vmatmul.mubr.bf16.vlgmr.msra.gmra.mrb[0].mxu1 %v34_v30 }
  0x3b   :  { %255 = vmatmul.mubr.bf16.gmra.mrb[4].mxu0 %v34_v30 }
 0x106   :  { %v246_v39 = vpop.f32.mrb[0].mxu0 }
 0x107   :  { %v247_v41 = vadd.f32 %v246_v39, %v72_v37  ;;  %v248_v42 = vpop.f32.mrb[1].mxu0 }
 0x108   :  { %v249_v43 = vadd.f32 %v248_v42, %v76_v38  ;;  %v250_v44 = vpop.f32.mrb[2].mxu0  ;;  %v435_v47 = vpop.f32.mrb[0].mxu1 }
 0x109   :  { %v251_v45 = vadd.f32 %v250_v44, %v72_v37  ;;  %v252_v46 = vpop.f32.mrb[3].mxu0  ;;  %v308_v50 = vadd.f32 %v435_v47, %v80_v40  ;;  %v299_v51 = vpop.f32.mrb[1].mxu1 }
 0x10a   :  { %v399_v48 = vpack.c.bf16 %v249_v43, %v247_v41  ;;  %v253_v49 = vadd.f32 %v252_v46, %v76_v38  ;;  %v300_v52 = vadd.f32 %v299_v51, %v80_v40  ;;  %v436_v53 = vpop.f32.mrb[2].mxu1 }
 0x10b   :  { %v404_v55 = vpack.c.bf16 %v308_v50, %v308_v50  ;;  %v311_v56 = vadd.f32 %v436_v53, %v80_v40  ;;  %v302_v57 = vpop.f32.mrb[3].mxu1 }
 0x10c   :  { %354 = vst [vmem:[%s577_s3] sm:$0xff] %v399_v48  ;;  %v401_v54 = vpack.c.bf16 %v253_v49, %v251_v45  ;;  %v400_v58 = vpack.c.bf16 %v300_v52, %v300_v52  ;;  %v303_v59 = vadd.f32 %v302_v57, %v80_v40 }
 0x10d   :  { %359 = vst [vmem:[%s577_s3 + $0x20] sm:$0xf] %v404_v55  ;;  %v406_v60 = vpack.c.bf16 %v311_v56, %v311_v56 }
 0x10e   :  { %356 = vst [vmem:[%s577_s3 + $0xc] sm:$0xff] %v401_v54  ;;  %v256_v61 = vpop.f32.mrb[4].mxu0  ;;  %355 = vst [vmem:[%s577_s3 + $0x8] sm:$0xf] %v400_v58  ;;  %v402_v63 = vpack.c.bf16 %v303_v59, %v303_v59 }
 0x10f   :  { %v257_v62 = vadd.f32 %v256_v61, %v72_v37  ;;  %v258_v0 = vpop.f32.mrb[5].mxu0  ;;  %361 = vst [vmem:[%s577_s3 + $0x2c] sm:$0xf] %v406_v60 }
 0x110   :  { %v259_v1 = vadd.f32 %v258_v0, %v76_v38  ;;  %v260_v2 = vpop.f32.mrb[6].mxu0  ;;  %357 = vst [vmem:[%s577_s3 + $0x14] sm:$0xf] %v402_v63 }
 0x111   :  { %v261_v3 = vadd.f32 %v260_v2, %v72_v37  ;;  %v262_v4 = vpop.f32.mrb[7].mxu0 }
 0x112   :  { %v403_v5 = vpack.c.bf16 %v259_v1, %v257_v62  ;;  %v263_v6 = vadd.f32 %v262_v4, %v76_v38 }
 0x114   :  { %358 = vst [vmem:[%s577_s3 + $0x18] sm:$0xff] %v403_v5  ;;  %v405_v7 = vpack.c.bf16 %v263_v6, %v261_v3 }
 0x116   :  { %360 = vst [vmem:[%s577_s3 + $0x24] sm:$0xff] %v405_v7 }
 0x117   :  { %366 = vsyncpa [#allocation3], 1 }

// kernel: transformer_encoder_layer.7
= control target key start
LH: loop header
LB: loop body
LE: loop exit
PB: predicated region body
PF: predicated region fallthrough
CT: control target
= control target key end

     0   :  { %v168_v10 = vlaneseq  ;;  %s420_s1 = inlined_call_operand.vmem [shape: bf16[128,128], index: 1, kind: input, shape index: {}]   ;;  %s421_s0 = inlined_call_operand.vmem [shape: bf16[32,128], index: 0, kind: input, shape index: {}]   ;;  %s422_s2 = inlined_call_operand.vmem [shape: f32[1,128], index: 2, kind: input, shape index: {}]   ;;  %s423_s3 = inlined_call_operand.vmem [shape: f32[32,128], index: 3, kind: input, shape index: {}]   ;;  %s424_s4 = inlined_call_operand.vmem [shape: f32[1,128], index: 4, kind: input, shape index: {}]   ;;  %s425_s5 = inlined_call_operand.vmem [shape: f32[1,128], index: 5, kind: input, shape index: {}]   ;;  %s426_s6 = inlined_call_operand.vmem [shape: f32[32,128], index: 6, kind: output, shape index: {}]  }
   0x1   :  { %v296_v0 = vld [vmem:[%s420_s1] sm:$0xff]   ;;  %v297_v1 = vld [vmem:[%s420_s1 + $0x8] sm:$0xff]   ;;  %v298_v2 = vld [vmem:[%s420_s1 + $0x10] sm:$0xff]  }
   0x2   :  { %276 = vmatprep.subr.bf16.mxu0 %v296_v0  ;;  %v299_v3 = vld [vmem:[%s420_s1 + $0x18] sm:$0xff]   ;;  %v304_v4 = vld [vmem:[%s421_s0] sm:$0xff]   ;;  %v301_v6 = vld [vmem:[%s420_s1 + $0x28] sm:$0xff]   ;;  %v169_v12 = vand.u32 127, %v168_v10 }
   0x3   :  { %277 = vmatpush3.bf16.msra.mxu0 %v296_v0  ;;  %292 = vmatprep.mubr.bf16.mxu0 %v304_v4  ;;  %v300_v5 = vld [vmem:[%s420_s1 + $0x20] sm:$0xff]   ;;  %v302_v7 = vld [vmem:[%s420_s1 + $0x30] sm:$0xff]   ;;  %v303_v8 = vld [vmem:[%s420_s1 + $0x38] sm:$0xff]  }
   0x4   :  { %278 = vmatprep.subr.bf16.mxu0 %v297_v1  ;;  %v305_v9 = vld [vmem:[%s421_s0 + $0x8] sm:$0xff]   ;;  %v253_v11 = vld [vmem:[%s422_s2] ss:$0 sm:$0xff]  ;;  %v162_v14 = vld [vmem:[%s423_s3 + $0x10] sm:$0xff]  ;;  %vm170_vm0 = vcmp.lt.s32.totalorder %v169_v12, 32 }
   0x5   :  { %v160_v17 = vld [vmem:[%s423_s3] sm:$0xff]  ;;  %v163_v20 = vld [vmem:[%s423_s3 + $0x18] sm:$0xff]  ;;  %v161_v24 = vld [vmem:[%s423_s3 + $0x8] sm:$0xff] }
   0x6   :  { %v265_v4 = vld [vmem:[%s425_s5] ss:$0 sm:$0xff] }
   0x7   :  { %279 = vmatpush3.bf16.msra.mxu0 %v297_v1 }
   0x8   :  { %280 = vmatprep.subr.bf16.mxu0 %v298_v2 }
   0xb   :  { %281 = vmatpush3.bf16.msra.mxu0 %v298_v2  ;;  %v264_v2 = vld [vmem:[%s424_s4] ss:$0 sm:$0xff] }
   0xc   :  { %282 = vmatprep.subr.bf16.mxu0 %v299_v3 }
   0xf   :  { %283 = vmatpush3.bf16.msra.mxu0 %v299_v3 }
  0x10   :  { %284 = vmatprep.subr.bf16.mxu0 %v300_v5 }
  0x13   :  { %285 = vmatpush3.bf16.msra.mxu0 %v300_v5 }
  0x14   :  { %286 = vmatprep.subr.bf16.mxu0 %v301_v6 }
  0x17   :  { %287 = vmatpush3.bf16.msra.mxu0 %v301_v6 }
  0x18   :  { %288 = vmatprep.subr.bf16.mxu0 %v302_v7 }
  0x1b   :  { %289 = vmatpush3.bf16.msra.mxu0 %v302_v7 }
  0x1c   :  { %290 = vmatprep.subr.bf16.mxu0 %v303_v8 }
  0x1f   :  { %291 = vmatpush3.bf16.msra.mxu0 %v303_v8 }
  0x22   :  { %293 = vmatmul.mubr.bf16.vlgmr.msra.gmra.mrb[0].mxu0 %v305_v9 }
  0xf5   :  { %v294_v13 = vpop.f32.mrb[0].mxu0 }
  0xf6   :  { %v154_v15 = vadd.f32 %v294_v13, %v253_v11  ;;  %v145_v16 = vpop.f32.mrb[1].mxu0 }
  0xf7   :  { %v146_v18 = vadd.f32 %v253_v11, %v145_v16  ;;  %v295_v19 = vpop.f32.mrb[2].mxu0 }
  0xf8   :  { %v157_v21 = vadd.f32 %v295_v19, %v253_v11  ;;  %v148_v22 = vpop.f32.mrb[3].mxu0  ;;  %v166_v23 = vadd.f32 %v162_v14, %v154_v15 }
  0xf9   :  { %v149_v25 = vadd.f32 %v253_v11, %v148_v22  ;;  %v164_v26 = vadd.f32 %v160_v17, %v146_v18 }
  0xfa   :  { %v173_v27 = vsel %vm170_vm0, %v166_v23, 0.0  ;;  %v167_v28 = vadd.f32 %v163_v20, %v157_v21 }
  0xfb   :  { %179 = vadd.xlane.f32.xlu1 %v173_v27  ;;  %v171_v29 = vsel %vm170_vm0, %v164_v26, 0.0  ;;  %v165_v30 = vadd.f32 %v161_v24, %v149_v25 }
  0xfc   :  { %175 = vadd.xlane.f32.xlu0 %v171_v29  ;;  %v174_v31 = vsel %vm170_vm0, %v167_v28, 0.0 }
  0xfd   :  { %v172_v32 = vsel %vm170_vm0, %v165_v30, 0.0 }
  0xff   :  { %181 = vadd.xlane.f32.xlu1 %v174_v31 }
 0x100   :  { %177 = vadd.xlane.f32.xlu0 %v172_v32 }
 0x188   :  { %v180_v33 = vpop.xlane.xlu1 %179 }
 0x189   :  { %v185_v34 = vmul.f32 0.03125, %v180_v33  ;;  %v176_v35 = vpop.xlane.xlu0 %175 }
 0x18a   :  { %v183_v36 = vmul.f32 0.03125, %v176_v35 }
 0x18b   :  { %v189_v37 = vsub.f32 %v166_v23, %v185_v34 }
 0x18c   :  { %v187_v38 = vsub.f32 %v164_v26, %v183_v36  ;;  %v182_v39 = vpop.xlane.xlu1 %181 }
 0x18d   :  { %v186_v40 = vmul.f32 0.03125, %v182_v39  ;;  %v178_v41 = vpop.xlane.xlu0 %177  ;;  %v193_v47 = vsel %vm170_vm0, %v189_v37, 0.0 }
 0x18e   :  { %v184_v42 = vmul.f32 0.03125, %v178_v41  ;;  %v191_v43 = vsel %vm170_vm0, %v187_v38, 0.0  ;;  %v197_v49 = vmul.f32 %v193_v47, %v193_v47 }
 0x18f   :  { %v195_v44 = vmul.f32 %v191_v43, %v191_v43  ;;  %v190_v45 = vsub.f32 %v167_v28, %v186_v40 }
 0x190   :  { %v188_v46 = vsub.f32 %v165_v30, %v184_v42 }
 0x191   :  { %199 = vadd.xlane.f32.xlu0 %v195_v44  ;;  %v194_v51 = vsel %vm170_vm0, %v190_v45, 0.0 }
 0x192   :  { %v192_v48 = vsel %vm170_vm0, %v188_v46, 0.0  ;;  %v198_v52 = vmul.f32 %v194_v51, %v194_v51 }
 0x193   :  { %v196_v50 = vmul.f32 %v192_v48, %v192_v48 }
 0x195   :  { %203 = vadd.xlane.f32.xlu0 %v197_v49  ;;  %201 = vadd.xlane.f32.xlu1 %v196_v50 }
 0x199   :  { %205 = vadd.xlane.f32.xlu1 %v198_v52 }
 0x21e   :  { %v200_v53 = vpop.xlane.xlu0 %199 }
 0x21f   :  { %v207_v54 = vmul.f32 0.03125, %v200_v53 }
 0x221   :  { %v211_v55 = vadd.f32 1e-05, %v207_v54 }
 0x222   :  { %v202_v56 = vpop.xlane.xlu1 %201  ;;  %v204_v57 = vpop.xlane.xlu0 %203 }
 0x223   :  { %306 = vrsqrt.f32 %v211_v55  ;;  %v208_v58 = vmul.f32 0.03125, %v202_v56  ;;  %v209_v59 = vmul.f32 0.03125, %v204_v57 }
 0x225   :  { %v212_v60 = vadd.f32 1e-05, %v208_v58  ;;  %v213_v61 = vadd.f32 1e-05, %v209_v59 }
 0x226   :  { %v206_v62 = vpop.xlane.xlu1 %205 }
 0x227   :  { %308 = vrsqrt.f32 %v212_v60  ;;  %v210_v63 = vmul.f32 0.03125, %v206_v62 }
 0x228   :  { %310 = vrsqrt.f32 %v213_v61 }
 0x229   :  { %v214_v0 = vadd.f32 1e-05, %v210_v63 }
 0x22b   :  { %312 = vrsqrt.f32 %v214_v0 }
 0x22d   :  { %v307_v1 = vpop.eup %306 }
 0x22e   :  { %v219_v3 = vmul.f32 %v307_v1, %v191_v43 }
 0x230   :  { %v230_v5 = vmul.f32 %v264_v2, %v219_v3 }
 0x231   :  { %v309_v6 = vpop.eup %308 }
 0x232   :  { %v311_v7 = vpop.eup %310  ;;  %v241_v8 = vadd.f32 %v265_v4, %v230_v5  ;;  %v220_v9 = vmul.f32 %v309_v6, %v192_v48 }
 0x233   :  { %v221_v10 = vmul.f32 %v311_v7, %v193_v47 }
 0x234   :  { %245 = vst [vmem:[%s426_s6] sm:$0xff] %v241_v8  ;;  %v231_v11 = vmul.f32 %v264_v2, %v220_v9 }
 0x235   :  { %v313_v12 = vpop.eup %312  ;;  %v232_v13 = vmul.f32 %v264_v2, %v221_v10 }
 0x236   :  { %v242_v14 = vadd.f32 %v265_v4, %v231_v11  ;;  %v222_v15 = vmul.f32 %v313_v12, %v194_v51 }
 0x237   :  { %v243_v16 = vadd.f32 %v265_v4, %v232_v13 }
 0x238   :  { %246 = vst [vmem:[%s426_s6 + $0x8] sm:$0xff] %v242_v14  ;;  %v233_v17 = vmul.f32 %v264_v2, %v222_v15 }
 0x239   :  { %247 = vst [vmem:[%s426_s6 + $0x10] sm:$0xff] %v243_v16 }
 0x23a   :  { %v244_v18 = vadd.f32 %v265_v4, %v233_v17 }
 0x23c   :  { %248 = vst [vmem:[%s426_s6 + $0x18] sm:$0xff] %v244_v18 }

// kernel: transformer_encoder_layer.6
= control target key start
LH: loop header
LB: loop body
LE: loop exit
PB: predicated region body
PF: predicated region fallthrough
CT: control target
= control target key end

     0   :  { %s1251_s12 = smov 0   ;;  %s1253_s13 = smov 0   ;;  %s1434_s0 = inlined_call_operand.vmem [shape: bf16[2,16,384], index: 0, kind: input, shape index: {}, may-alias: {0,1,2}]   ;;  %s1435_s1 = inlined_call_operand.vmem [shape: bf16[2,16,384], index: 1, kind: input, shape index: {}, may-alias: {0,1,2}]   ;;  %s1436_s2 = inlined_call_operand.vmem [shape: bf16[2,16,384], index: 2, kind: input, shape index: {}, may-alias: {0,1,2}]   ;;  %s1437_s3 = inlined_call_operand.vmem [shape: bf16[2,16,128], index: 3, kind: output, shape index: {}]  }
   0x1   :  { %s1255_s14 = smov 0  }
   0x2 LB: > { %s1009_s15 = sadd.s32 4294967295, %s1221_s14   ;;  %s1268_s16 = sadd.s32 1, %s1221_s14   ;;  %s1221_s14 = sphi %s1255_s14, %s1441_s14   ;;  %s1217_s13 = sphi %s1253_s13, %s1440_s13   ;;  %s1213_s12 = sphi %s1251_s12, %s1439_s12  }
   0x3   : > { %s17_s17 = ssub.s32 %s1221_s14, %s1268_s16  ;;  %s20_s18 = sadd.s32 1, %s1217_s13 }
   0x4   : > { %p18_p0 = scmp.eq.s32.totalorder %s17_s17, 0  ;;  %p27_p1 = scmp.ne.s32.totalorder %s1217_s13, %s1213_s12 }
   0x5   : > { %p28_p2 = scmp.eq.s32.totalorder %s1221_s14, 0  ;;  %p1012_p4 = scmp.ge.s32.totalorder %s1221_s14, 2 }
   0x6   : > { %s1277_s19 = scalar_select %p18_p0, %s1217_s13, %s20_s18  }
   0x7   : > { %p1279_p3 = por %p28_p2, %p27_p1  ;;  %131 = sbr.rel (%p1012_p4) target bundleno = 35 (0x23), region = 16 }
   0xe   : > { %134 = sbr.rel (!%p1279_p3) target bundleno = 21 (0x15), region = 20  ;;  %s136_s21 = sand.u32 (%p1279_p3), 1, %s1217_s13  }
   0xf   : > { %s1116_s22 = smul.u32 (%p1279_p3), 24, %s1221_s14  ;;  %s1013_s23 = sshll.u32 (%p1279_p3), %s136_s21, 3 }
  0x10   : > { %s138_s27 = scalar_lea.vmem (%p1279_p3), [#allocation2], %s1013_s23 }
  0x11   : > { %s141_s26 = scalar_lea.vmem (%p1279_p3), %s1434_s0, %s1116_s22 }
  0x12   : > { %v157_v0 = vld [vmem:[%s141_s26] sm:$0xf] (%p1279_p3)  ;;  %v159_v1 = vld [vmem:[%s141_s26 + $0xc] sm:$0xf] (%p1279_p3) }
  0x13   : > { %158 = vst [vmem:[%s138_s27] sm:$0xf] (%p1279_p3), %v157_v0  ;;  %160 = vst [vmem:[%s138_s27 + $0x4] sm:$0xf] (%p1279_p3), %v159_v1 }
  0x15 PF: > { %187 = sbr.rel (!%p1279_p3) target bundleno = 28 (0x1c), region = 61  ;;  %s189_s28 = sand.u32 (%p1279_p3), 1, %s1217_s13  }
  0x16   : > { %s1016_s29 = smul.u32 (%p1279_p3), 24, %s1221_s14  ;;  %s1015_s30 = sshll.u32 (%p1279_p3), %s189_s28, 3 }
  0x17   : > { %s191_s7 = scalar_lea.vmem (%p1279_p3), [#allocation3], %s1015_s30 }
  0x18   : > { %s937_s6 = scalar_lea.vmem (%p1279_p3), %s1435_s1, %s1016_s29 }
  0x19   : > { %v1017_v2 = vld [vmem:[%s937_s6 + $0x4] sm:$0xf] (%p1279_p3)  ;;  %v1018_v3 = vld [vmem:[%s937_s6 + $0x10] sm:$0xf] (%p1279_p3) }
  0x1a   : > { %212 = vst [vmem:[%s191_s7] sm:$0xf] (%p1279_p3), %v1017_v2  ;;  %214 = vst [vmem:[%s191_s7 + $0x4] sm:$0xf] (%p1279_p3), %v1018_v3 }
  0x1c PF: > { %241 = sbr.rel (!%p1279_p3) target bundleno = 35 (0x23), region = 102  ;;  %s243_s8 = sand.u32 (%p1279_p3), 1, %s1217_s13  }
  0x1d   : > { %s1020_s9 = smul.u32 (%p1279_p3), 24, %s1221_s14  ;;  %s1019_s10 = sshll.u32 (%p1279_p3), %s243_s8, 3 }
  0x1e   : > { %s245_s21 = scalar_lea.vmem (%p1279_p3), [#allocation4], %s1019_s10 }
  0x1f   : > { %s943_s18 = scalar_lea.vmem (%p1279_p3), %s1436_s2, %s1020_s9 }
  0x20   : > { %v1021_v4 = vld [vmem:[%s943_s18 + $0x8] sm:$0xf] (%p1279_p3)  ;;  %v1022_v5 = vld [vmem:[%s943_s18 + $0x14] sm:$0xf] (%p1279_p3) }
  0x21   : > { %266 = vst [vmem:[%s245_s21] sm:$0xf] (%p1279_p3), %v1021_v4  ;;  %268 = vst [vmem:[%s245_s21 + $0x4] sm:$0xf] (%p1279_p3), %v1022_v5 }
  0x23 PF: > { %p1023_p5 = scmp.ge.s32.totalorder %s1221_s14, 1  ;;  %p294_p6 = scmp.lt.s32.totalorder %s1221_s14, 3 }
  0x25   : > { %p295_p7 = pnand %p1023_p5, %p294_p6 }
  0x26   : > { %s301_s20 = sand.u32 (!%p295_p7), 1, %s1213_s12   ;;  %v1223_v6 = vmov (!%p295_p7), 0.0   ;;  %vm1224_vm0 = vmmov (!%p295_p7), 0   ;;  %vm371_vm1 = vcmask (!%p295_p7), 64512   ;;  %s1225_s24 = smov (!%p295_p7), 120   ;;  %v358_v10 = vlaneseq (!%p295_p7) }
  0x27   : > { %298 = sbr.rel (%p295_p7) target bundleno = 1213 (0x4bd), region = 143  ;;  %1068 = vmatprep.subr.bf16.mxu0 (!%p295_p7), %v1223_v6  ;;  %s1309_s22 = sshll.u32 (!%p295_p7), %s301_s20, 3  ;;  %1070 = vmatprep.mubr.msk.bf16.mxu0 (!%p295_p7), %vm1224_vm0, %v1223_v6  ;;  %vm421_vm3 = vcmask (!%p295_p7), 130048   ;;  %vm892_vm4 = vcmask (!%p295_p7), 195584   ;;  %vm895_vm5 = vcmask (!%p295_p7), 261120  }
  0x28   : > { %1074 = vmatprep.subr.bf16.mxu1 (!%p295_p7), %v1223_v6  ;;  %1076 = vmatprep.mubr.msk.bf16.mxu1 (!%p295_p7), %vm1224_vm0, %v1223_v6  ;;  %s310_s23 = scalar_lea.vmem (!%p295_p7), [#allocation3], %s1309_s22  ;;  %s303_s12 = scalar_lea.vmem (!%p295_p7), [#allocation2], %s1309_s22  ;;  %v1328_v11 = vand.u32 (!%p295_p7), 127, %v358_v10 }
  0x29   : > { %v1164_v7 = vld [vmem:[%s310_s23] sm:$0xff] (!%p295_p7)   ;;  %v1165_v9 = vld [vmem:[%s303_s12] sm:$0xff] (!%p295_p7)   ;;  %s1226_s25 = smov (!%p295_p7), 112   ;;  %s1227_s26 = smov (!%p295_p7), 104  }
  0x2a   : > { %v376_v8 = vsel (!%p295_p7), %vm371_vm1, %v1164_v7, 0  ;;  %497 = vrot.lane.b32.xlu1 (!%p295_p7), %v1164_v7, %s1225_s24  ;;  %vm360_vm2 = vcmp.lt.s32.totalorder (!%p295_p7), %v1328_v11, 8  ;;  %s317_s27 = scalar_lea.vmem (!%p295_p7), [#allocation4], %s1309_s22  ;;  %s1228_s28 = smov (!%p295_p7), 8  }
  0x2b   : > { %1069 = vmatpush3.bf16.xpose.msra.mxu0 (!%p295_p7), %v376_v8  ;;  %v1338_v20 = vld [vmem:[%s317_s27] sm:$0xff] (!%p295_p7)   ;;  %s1229_s29 = smov (!%p295_p7), 16   ;;  %s1230_s30 = smov (!%p295_p7), 24  }
  0x2c   : > { %1086 = vmatprep.subr.bf16.mxu0 (!%p295_p7), %v1223_v6  ;;  %1075 = vmatpush3.bf16.msra.mxu1 (!%p295_p7), %v1338_v20  ;;  %p346_p8 = scmp.lt.s32.totalorder (!%p295_p7), %s1009_s15, 1 }
  0x2d   : > { %1080 = vmatprep.subr.bf16.mxu1 (!%p295_p7), %v1223_v6 }
  0x2e   : > { %495 = vrot.lane.b32.xlu1 %v1165_v9, %s1225_s24  ;;  %s1443_s15 = smov (!%p346_p8, %s1009_s15), 1 }
  0x2f   : > { %s1044_s4 = sshll.u32 %s1443_s15, 3 }
  0x30   : > { %s350_s6 = scalar_lea.vmem %s1437_s3, %s1044_s4 }
  0x32   : > { %1071 = vmatmul.mubr.msk.bf16.vlgmr.msra.gmra.mrb[0].mxu0 %vm371_vm1, %v1165_v9  ;;  %618 = vrot.lane.b32.xlu1 %v1165_v9, %s1226_s25 }
  0x33   : > { %1088 = vmatprep.mubr.msk.bf16.mxu0 %vm1224_vm0, %v1223_v6 }
  0x36   : > { %743 = vrot.lane.b32.xlu1 %v1164_v7, %s1227_s26 }
  0x3a   : > { %741 = vrot.lane.b32.xlu1 %v1165_v9, %s1227_s26 }
  0x9c   : > { %v498_v27 = vpop.permute.xlu1 %497 }
  0x9d   : > { %v503_v30 = vsel %vm371_vm1, %v498_v27, 0 }
  0xa0   : > { %v496_v32 = vpop.permute.xlu1 %495 }
  0xa4   : > { %v619_v34 = vpop.permute.xlu1 %618 }
  0xa8   : > { %v744_v36 = vpop.permute.xlu1 %743 }
  0xa9   : > { %v749_v37 = vsel %vm371_vm1, %v744_v36, 0 }
  0xac   : > { %v742_v38 = vpop.permute.xlu1 %741 }
 0x105   : > { %v412_v12 = vpop.f32.mrb[0].mxu0 }
 0x106   : > { %v419_v13 = vsel %vm360_vm2, %v412_v12, -inf  ;;  %v1072_v14 = vpop.f32.mrb[1].mxu0 }
 0x107   : > { %v415_v15 = vpop.f32.mrb[2].mxu0  ;;  %v422_v16 = vsel %vm421_vm3, %v419_v13, -inf }
 0x108   : > { %v420_v17 = vsel %vm360_vm2, %v415_v15, -inf  ;;  %423 = vmax.xlane.f32.xlu0 %v422_v16  ;;  %v1073_v18 = vpop.f32.mrb[3].mxu0 }
 0x109   : > { %v425_v19 = vsel %vm421_vm3, %v420_v17, -inf }
 0x10c   : > { %426 = vmax.xlane.f32.xlu0 %v425_v19 }
 0x122   : > { %620 = vrot.lane.b32.xlu0 %v1164_v7, %s1226_s25 }
 0x195   : > { %v424_v21 = vpop.xlane.xlu0 %423 }
 0x196   : > { %v428_v22 = vsub.f32 %v419_v13, %v424_v21 }
 0x198   : > { %v430_v23 = vmul.f32 1.442695, %v428_v22 }
 0x199   : > { %v427_v24 = vpop.xlane.xlu0 %426 }
 0x19a   : > { %v429_v25 = vsub.f32 %v420_v17, %v427_v24  ;;  %1167 = vpow2.f32 %v430_v23 }
 0x19c   : > { %v432_v26 = vmul.f32 1.442695, %v429_v25 }
 0x19d   : > { %v621_v33 = vpop.permute.xlu0 %620 }
 0x19e   : > { %1169 = vpow2.f32 %v432_v26  ;;  %v626_v35 = vsel %vm371_vm1, %v621_v33, 0 }
 0x1a4   : > { %v1343_v28 = vpop.eup %1167 }
 0x1a8   : > { %v1345_v29 = vpop.eup %1169 }
 0x1a9   : > { %v440_v31 = vpack.c.bf16 %v1345_v29, %v1343_v28 }
 0x1ab   : > { %1077 = vmatmul.mubr.msk.bf16.vlgmr.msra.gmra.mrb[0].mxu1 %vm421_vm3, %v440_v31 }
 0x1ac   : > { %1081 = vmatpush3.bf16.xpose.msra.mxu1 %v503_v30  ;;  %1082 = vmatprep.mubr.msk.bf16.mxu1 %vm1224_vm0, %v1223_v6 }
 0x1ad   : > { %1092 = vmatprep.subr.bf16.mxu1 %v1223_v6 }
 0x1b3   : > { %1083 = vmatmul.mubr.msk.bf16.vlgmr.msra.gmra.mrb[4].mxu1 %vm371_vm1, %v496_v32 }
 0x1b4   : > { %1093 = vmatpush3.bf16.xpose.msra.mxu1 %v626_v35  ;;  %1094 = vmatprep.mubr.msk.bf16.mxu1 %vm1224_vm0, %v1223_v6  ;;  %v434_v35 = vsel %vm421_vm3, %v1343_v28, 0.0 }
 0x1b5   : > { %1104 = vmatprep.subr.bf16.mxu1 %v1223_v6 }
 0x1bb   : > { %1095 = vmatmul.mubr.msk.bf16.vlgmr.msra.gmra.mrb[8].mxu1 %vm371_vm1, %v619_v34 }
 0x1bc   : > { %1105 = vmatpush3.bf16.xpose.msra.mxu1 %v749_v37  ;;  %1106 = vmatprep.mubr.msk.bf16.mxu1 %vm1224_vm0, %v1223_v6 }
 0x1c3   : > { %1107 = vmatmul.mubr.msk.bf16.vlgmr.msra.gmra.mrb[12].mxu1 %vm371_vm1, %v742_v38 }
 0x27e   : > { %v1364_v39 = vpop.f32.mrb[0].mxu1 }
 0x27f   : > { %v1078_v40 = vpop.f32.mrb[1].mxu1 }
 0x280   : > { %v1366_v41 = vpop.f32.mrb[2].mxu1 }
 0x281   : > { %v1079_v42 = vpop.f32.mrb[3].mxu1 }
 0x286   : > { %v539_v43 = vpop.f32.mrb[4].mxu1 }
 0x287   : > { %v546_v44 = vsel %vm360_vm2, %v539_v43, -inf  ;;  %v1084_v45 = vpop.f32.mrb[5].mxu1 }
 0x288   : > { %v542_v46 = vpop.f32.mrb[6].mxu1  ;;  %v548_v47 = vsel %vm421_vm3, %v546_v44, -inf }
 0x289   : > { %v547_v48 = vsel %vm360_vm2, %v542_v46, -inf  ;;  %549 = vmax.xlane.f32.xlu1 %v548_v47  ;;  %v1085_v49 = vpop.f32.mrb[7].mxu1 }
 0x28a   : > { %v551_v50 = vsel %vm421_vm3, %v547_v48, -inf }
 0x28b   : > { %552 = vmax.xlane.f32.xlu0 %v551_v50 }
 0x28e   : > { %v662_v51 = vpop.f32.mrb[8].mxu1 }
 0x28f   : > { %v669_v52 = vsel %vm360_vm2, %v662_v51, -inf  ;;  %v1096_v53 = vpop.f32.mrb[9].mxu1 }
 0x290   : > { %v665_v54 = vpop.f32.mrb[10].mxu1  ;;  %v671_v55 = vsel %vm421_vm3, %v669_v52, -inf }
 0x291   : > { %v670_v56 = vsel %vm360_vm2, %v665_v54, -inf  ;;  %672 = vmax.xlane.f32.xlu1 %v671_v55  ;;  %v1097_v57 = vpop.f32.mrb[11].mxu1 }
 0x292   : > { %v674_v58 = vsel %vm421_vm3, %v670_v56, -inf }
 0x295   : > { %675 = vmax.xlane.f32.xlu1 %v674_v58 }
 0x296   : > { %v785_v59 = vpop.f32.mrb[12].mxu1 }
 0x297   : > { %v792_v60 = vsel %vm360_vm2, %v785_v59, -inf  ;;  %v1108_v61 = vpop.f32.mrb[13].mxu1 }
 0x298   : > { %v794_v62 = vsel %vm421_vm3, %v792_v60, -inf  ;;  %v788_v63 = vpop.f32.mrb[14].mxu1 }
 0x299   : > { %795 = vmax.xlane.f32.xlu0 %v794_v62  ;;  %v1109_v0 = vpop.f32.mrb[15].mxu1  ;;  %v793_v1 = vsel %vm360_vm2, %v788_v63, -inf }
 0x29a   : > { %v797_v2 = vsel %vm421_vm3, %v793_v1, -inf }
 0x2a6   : > { %690 = vrot.lane.b32.xlu1 %v1338_v20, %s1226_s25 }
 0x2af   : > { %567 = vrot.lane.b32.xlu0 %v1338_v20, %s1225_s24 }
 0x2ca   : > { %798 = vmax.xlane.f32.xlu1 %v797_v2 }
 0x2db   : > { %813 = vrot.lane.b32.xlu1 %v1338_v20, %s1227_s26 }
 0x316   : > { %v550_v3 = vpop.xlane.xlu1 %549 }
 0x317   : > { %v554_v4 = vsub.f32 %v546_v44, %v550_v3 }
 0x318   : > { %v553_v5 = vpop.xlane.xlu0 %552 }
 0x319   : > { %v556_v7 = vmul.f32 1.442695, %v554_v4  ;;  %v555_v8 = vsub.f32 %v547_v48, %v553_v5 }
 0x31b   : > { %1171 = vpow2.f32 %v556_v7  ;;  %v558_v9 = vmul.f32 1.442695, %v555_v8 }
 0x31d   : > { %1173 = vpow2.f32 %v558_v9 }
 0x31e   : > { %v673_v10 = vpop.xlane.xlu1 %672 }
 0x31f   : > { %v677_v12 = vsub.f32 %v669_v52, %v673_v10 }
 0x321   : > { %v679_v13 = vmul.f32 1.442695, %v677_v12 }
 0x322   : > { %v676_v14 = vpop.xlane.xlu1 %675 }
 0x323   : > { %1175 = vpow2.f32 %v679_v13  ;;  %v678_v11 = vsub.f32 %v670_v56, %v676_v14 }
 0x325   : > { %v1172_v15 = vpop.eup %1171  ;;  %v681_v16 = vmul.f32 1.442695, %v678_v11 }
 0x326   : > { %v796_v17 = vpop.xlane.xlu0 %795  ;;  %v560_v18 = vsel %vm421_vm3, %v1172_v15, 0.0  ;;  %v691_v26 = vpop.permute.xlu1 %690 }
 0x327   : > { %v1174_v19 = vpop.eup %1173  ;;  %1177 = vpow2.f32 %v681_v16  ;;  %v800_v20 = vsub.f32 %v792_v60, %v796_v17  ;;  %561 = vadd.xlane.f32.xlu0 %v560_v18 }
 0x328   : > { %v563_v21 = vsel %vm421_vm3, %v1174_v19, 0.0  ;;  %v566_v24 = vpack.c.bf16 %v1174_v19, %v1172_v15 }
 0x329   : > { %v802_v22 = vmul.f32 1.442695, %v800_v20  ;;  %564 = vadd.xlane.f32.xlu1 %v563_v21 }
 0x32a   : > { %v568_v23 = vpop.permute.xlu0 %567 }
 0x32b   : > { %1179 = vpow2.f32 %v802_v22  ;;  %1087 = vmatpush3.bf16.msra.mxu0 %v568_v23 }
 0x32c   : > { %1098 = vmatprep.subr.bf16.mxu0 %v1223_v6 }
 0x32d   : > { %v1176_v25 = vpop.eup %1175 }
 0x32e   : > { %1089 = vmatmul.mubr.msk.bf16.vlgmr.msra.gmra.mrb[4].mxu0 %vm421_vm3, %v566_v24  ;;  %v683_v27 = vsel %vm421_vm3, %v1176_v25, 0.0 }
 0x32f   : > { %684 = vadd.xlane.f32.xlu0 %v683_v27  ;;  %1099 = vmatpush3.bf16.msra.mxu0 %v691_v26 }
 0x330   : > { %1100 = vmatprep.mubr.msk.bf16.mxu0 %vm1224_vm0, %v1223_v6  ;;  %1110 = vmatprep.subr.bf16.mxu0 %v1223_v6 }
 0x331   : > { %v1178_v30 = vpop.eup %1177 }
 0x332   : > { %v686_v31 = vsel %vm421_vm3, %v1178_v30, 0.0  ;;  %v689_v32 = vpack.c.bf16 %v1178_v30, %v1176_v25 }
 0x333   : > { %687 = vadd.xlane.f32.xlu0 %v686_v31 }
 0x335   : > { %v1180_v33 = vpop.eup %1179 }
 0x336   : > { %1101 = vmatmul.mubr.msk.bf16.vlgmr.msra.gmra.mrb[8].mxu0 %vm421_vm3, %v689_v32  ;;  %v806_v34 = vsel %vm421_vm3, %v1180_v33, 0.0 }
 0x337   : > { %807 = vadd.xlane.f32.xlu1 %v806_v34  ;;  %1112 = vmatprep.mubr.msk.bf16.mxu0 %vm1224_vm0, %v1223_v6  ;;  %v437_v6 = vsel %vm421_vm3, %v1345_v29, 0.0 }
 0x33b   : > { %435 = vadd.xlane.f32.xlu1 %v434_v35 }
 0x357   : > { %v799_v36 = vpop.xlane.xlu1 %798 }
 0x358   : > { %v801_v37 = vsub.f32 %v793_v1, %v799_v36 }
 0x35a   : > { %v804_v38 = vmul.f32 1.442695, %v801_v37 }
 0x35b   : > { %v814_v40 = vpop.permute.xlu1 %813 }
 0x35c   : > { %1181 = vpow2.f32 %v804_v38  ;;  %1111 = vmatpush3.bf16.msra.mxu0 %v814_v40 }
 0x366   : > { %v1182_v42 = vpop.eup %1181 }
 0x367   : > { %v809_v43 = vsel %vm421_vm3, %v1182_v42, 0.0  ;;  %v812_v44 = vpack.c.bf16 %v1182_v42, %v1180_v33 }
 0x368   : > { %810 = vadd.xlane.f32.xlu0 %v809_v43 }
 0x369   : > { %1113 = vmatmul.mubr.msk.bf16.vlgmr.msra.gmra.mrb[12].mxu0 %vm421_vm3, %v812_v44 }
 0x36c   : > { %438 = vadd.xlane.f32.xlu0 %v437_v6 }
 0x3b4   : > { %v562_v45 = vpop.xlane.xlu0 %561 }
 0x3b5   : > { %1183 = vrcp.f32 %v562_v45 }
 0x3b6   : > { %v565_v28 = vpop.xlane.xlu1 %564 }
 0x3b7   : > { %1185 = vrcp.f32 %v565_v28 }
 0x3bc   : > { %v685_v46 = vpop.xlane.xlu0 %684 }
 0x3bd   : > { %1187 = vrcp.f32 %v685_v46 }
 0x3bf   : > { %v1184_v49 = vpop.eup %1183 }
 0x3c0   : > { %v688_v47 = vpop.xlane.xlu0 %687 }
 0x3c1   : > { %1189 = vrcp.f32 %v688_v47  ;;  %v1186_v51 = vpop.eup %1185 }
 0x3c4   : > { %v808_v1 = vpop.xlane.xlu1 %807 }
 0x3c5   : > { %1191 = vrcp.f32 %v808_v1 }
 0x3c7   : > { %v1188_v57 = vpop.eup %1187 }
 0x3c8   : > { %v436_v14 = vpop.xlane.xlu1 %435 }
 0x3cb   : > { %v1190_v59 = vpop.eup %1189 }
 0x3cf   : > { %v1192_v4 = vpop.eup %1191 }
 0x3f5   : > { %v811_v2 = vpop.xlane.xlu0 %810 }
 0x3f6   : > { %1193 = vrcp.f32 %v811_v2 }
 0x3f7   : > { %1195 = vrcp.f32 %v436_v14 }
 0x3f9   : > { %v439_v11 = vpop.xlane.xlu0 %438 }
 0x3fa   : > { %1197 = vrcp.f32 %v439_v11 }
 0x400   : > { %v1194_v7 = vpop.eup %1193 }
 0x401   : > { %v607_v48 = vpop.f32.mrb[4].mxu0  ;;  %v1196_v16 = vpop.eup %1195 }
 0x402   : > { %v1090_v50 = vpop.f32.mrb[5].mxu0  ;;  %v616_v53 = vmul.f32 %v1184_v49, %v607_v48  ;;  %v493_v23 = vmul.f32 %v1196_v16, %v1364_v39 }
 0x403   : > { %v610_v52 = vpop.f32.mrb[6].mxu0 }
 0x404   : > { %v617_v54 = vmul.f32 %v1186_v51, %v610_v52  ;;  %v1091_v55 = vpop.f32.mrb[7].mxu0  ;;  %v1198_v18 = vpop.eup %1197 }
 0x405   : > { %v494_v24 = vmul.f32 %v1198_v18, %v1366_v41 }
 0x406   : > { %v1149_v56 = vpack.i.bf16 %v617_v54, %v616_v53 }
 0x408   : > { %1150 = vrot.lane.b32.xlu1 %v1149_v56, %s1228_s28 }
 0x409   : > { %v730_v29 = vpop.f32.mrb[8].mxu0 }
 0x40a   : > { %v1102_v58 = vpop.f32.mrb[9].mxu0  ;;  %v739_v61 = vmul.f32 %v1188_v57, %v730_v29 }
 0x40b   : > { %v733_v60 = vpop.f32.mrb[10].mxu0 }
 0x40c   : > { %v740_v62 = vmul.f32 %v1190_v59, %v733_v60  ;;  %v1103_v63 = vpop.f32.mrb[11].mxu0 }
 0x40e   : > { %v1154_v0 = vpack.i.bf16 %v740_v62, %v739_v61 }
 0x410   : > { %1155 = vrot.lane.b32.xlu0 %v1154_v0, %s1229_s29 }
 0x43c   : > { %v853_v3 = vpop.f32.mrb[12].mxu0 }
 0x43d   : > { %v1114_v5 = vpop.f32.mrb[13].mxu0  ;;  %v862_v9 = vmul.f32 %v1192_v4, %v853_v3 }
 0x43e   : > { %v856_v8 = vpop.f32.mrb[14].mxu0 }
 0x43f   : > { %v863_v10 = vmul.f32 %v1194_v7, %v856_v8  ;;  %v1115_v12 = vpop.f32.mrb[15].mxu0 }
 0x441   : > { %v1159_v13 = vpack.i.bf16 %v863_v10, %v862_v9 }
 0x443   : > { %1160 = vrot.lane.b32.xlu1 %v1159_v13, %s1230_s30 }
 0x47a   : > { %v1151_v15 = vpop.permute.xlu1 %1150 }
 0x47b   : > { %v1153_v19 = vunpack.i.h.bf16 %v1151_v15  ;;  %v1152_v20 = vunpack.i.l.bf16 %v1151_v15 }
 0x47d   : > { %v889_v26 = vsel %vm371_vm1, %v494_v24, %v1153_v19  ;;  %v888_v27 = vsel %vm371_vm1, %v493_v23, %v1152_v20 }
 0x482   : > { %v1156_v17 = vpop.permute.xlu0 %1155 }
 0x483   : > { %v1158_v21 = vunpack.i.h.bf16 %v1156_v17  ;;  %v1157_v22 = vunpack.i.l.bf16 %v1156_v17 }
 0x485   : > { %v891_v32 = vsel %vm421_vm3, %v889_v26, %v1158_v21  ;;  %v890_v33 = vsel %vm421_vm3, %v888_v27, %v1157_v22 }
 0x4b5   : > { %v1161_v25 = vpop.permute.xlu1 %1160 }
 0x4b6   : > { %v1163_v30 = vunpack.i.h.bf16 %v1161_v25  ;;  %v1162_v31 = vunpack.i.l.bf16 %v1161_v25 }
 0x4b8   : > { %v894_v34 = vsel %vm892_vm4, %v891_v32, %v1163_v30  ;;  %v893_v35 = vsel %vm892_vm4, %v890_v33, %v1162_v31 }
 0x4b9   : > { %v897_v39 = vsel %vm895_vm5, %v894_v34, 0.0  ;;  %v896_v41 = vsel %vm895_vm5, %v893_v35, 0.0 }
 0x4ba   : > { %v1050_v36 = vpack.c.bf16 %v897_v39, %v896_v41 }
 0x4bc   : > { %1051 = vst [vmem:[%s350_s6] sm:$0xff] %v1050_v36  }
 0x4bd PF: > { %p10_p9 = scmp.ge.s32.totalorder %s1268_s16, 4   ;;  %s1439_s12 = smov %s1217_s13 }
 0x4be   : > { %s1440_s13 = smov %s1277_s19  ;;  %s1441_s14 = smov %s1268_s16 }
 0x4bf   :  { %12 = sbr.rel (!%p10_p9) target bundleno = 2 (0x2), region = 206 }

</bundles_post_ra>
